<compile_context>
chip_gen: v6e
topology: v6e:2x2x1
jax: 0.10.0
libtpu: 0.0.40
codegen_flags: <defaults>
</compile_context>

<pallas_src>
import functools

import jax
import jax.numpy as jnp
from jax.experimental import pallas as pl
from jax.experimental.pallas import tpu as pltpu


_CPAD = 16          # pad channels to 16 -> every conv is a uniform K=144 matmul
_K = 9 * _CPAD      # 144


# ---------------------------------------------------------------------------
# Fused Pallas kernel: stem conv+bn+relu, block conv1+bn+relu,
# block conv2+bn (+residual) +relu — B_TILE lane-packed images per grid step.
# ---------------------------------------------------------------------------
def _fused_client_kernel(x_ref, w1_ref, w2_ref, w3_ref, b_ref, o_ref, *, H, W):
    """x_ref  : (16, L)   bf16  lane-packed activations, L = B_TILE * H*W
    wk_ref : (16, 144) bf16  3x3 weights with BN scale folded in
    b_ref  : (16, 3)   f32   packed per-channel BN biases (one column / layer)
    o_ref  : (16, L)   f32   lane-packed output."""
    HW = H * W
    L = x_ref.shape[1]

    # Per-image tap-validity masks (bool), shared by all three layers.
    # lidx is the pixel index WITHIN its image, so rolls cannot leak across
    # packed image boundaries.
    idx = jax.lax.broadcasted_iota(jnp.int32, (1, L), 1)
    if (HW & (HW - 1)) == 0:
        lidx = jnp.bitwise_and(idx, HW - 1)
    else:
        lidx = idx % HW
    if (W & (W - 1)) == 0:
        col = jnp.bitwise_and(lidx, W - 1)
    else:
        col = lidx % W

    tap_offsets = [(dh, dw) for dh in (-1, 0, 1) for dw in (-1, 0, 1)]
    tap_masks = []
    for dh, dw in tap_offsets:
        ridx = lidx + dh * W                      # == (row+dh)*W + col
        tap_masks.append((ridx >= 0) & (ridx < HW)
                         & (col + dw >= 0) & (col + dw < W))

    zero_bf16 = jnp.zeros((), jnp.bfloat16)

    def im2col(a_bf16):
        """(16, L) bf16 activation -> (144, L) bf16 shifted-tap matrix
        (3x3 conv, stride 1, zero padding 1), all math in bf16."""
        taps = []
        for (dh, dw), mask in zip(tap_offsets, tap_masks):
            shift = dh * W + dw
            t = a_bf16 if shift == 0 else jnp.roll(a_bf16, -shift, axis=1)
            taps.append(jnp.where(mask, t, zero_bf16))
        return jnp.concatenate(taps, axis=0)      # 16-row (bf16-tile) aligned

    def conv_bias_relu(a_bf16, w_ref, bias_col, residual=None):
        # Single K=144 bf16 matmul on the MXU, f32 accumulation.
        acc = jnp.dot(w_ref[...], im2col(a_bf16),
                      preferred_element_type=jnp.float32)        # (16, L) f32
        y = acc + b_ref[:, bias_col:bias_col + 1]                # folded BN bias
        if residual is not None:
            y = y + residual
        return jnp.maximum(y, 0.0)

    a1 = conv_bias_relu(x_ref[...], w1_ref, 0)                       # stem
    a2 = conv_bias_relu(a1.astype(jnp.bfloat16), w2_ref, 1)          # block conv1
    a3 = conv_bias_relu(a2.astype(jnp.bfloat16), w3_ref, 2,          # block conv2
                        residual=a1)
    o_ref[...] = a3


# ---------------------------------------------------------------------------
# Wrapper
# ---------------------------------------------------------------------------
def _prep_weight(w_oihw, bn, eps):
    """(Cout, Cin, 3, 3) + BN -> ((Cout, 144) bf16 scale-folded weight,
    (Cout,) f32 bias).  K index = (kh*3+kw)*_CPAD + ci."""
    cout, cin = w_oihw.shape[0], w_oihw.shape[1]
    inv_std = 1.0 / jnp.sqrt(bn["var"].astype(jnp.float32) + eps)
    scale = bn["gamma"].astype(jnp.float32) * inv_std
    bias = bn["beta"].astype(jnp.float32) - bn["mean"].astype(jnp.float32) * scale

    wt = jnp.transpose(w_oihw.astype(jnp.float32), (0, 2, 3, 1))   # (O, kh, kw, I)
    wt = wt * scale.reshape(cout, 1, 1, 1)                         # fold BN scale in f32
    wt = jnp.pad(wt, ((0, 0), (0, 0), (0, 0), (0, _CPAD - cin)))
    return wt.reshape(cout, _K).astype(jnp.bfloat16), bias


def resnet20_client_forward(x_nchw, p, *, eps=1e-5, b_tile=None):
    """relu(bn1(conv1(x))) -> BasicBlock(16,16).  x_nchw: (N,3,H,W) -> (N,16,H,W)."""
    N, Cin, H, W = x_nchw.shape
    HW = H * W
    Cout = p["w1"].shape[0]

    if b_tile is None:
        # >= 2 grid steps so the "parallel" batch axis shards across both
        # TensorCores on v7x; larger batches pack many images per matmul.
        b_tile = max(1, pl.cdiv(N, 2))
    num_tiles = pl.cdiv(N, b_tile)
    n_pad = num_tiles * b_tile
    L = b_tile * HW

    # NCHW -> lane-packed (C, N*HW) bf16, channels zero-padded to 16.
    x = x_nchw.astype(jnp.float32).reshape(N, Cin, HW)
    x = jnp.pad(x, ((0, n_pad - N), (0, _CPAD - Cin), (0, 0)))
    x = jnp.transpose(x, (1, 0, 2)).reshape(_CPAD, n_pad * HW).astype(jnp.bfloat16)

    w1, b1 = _prep_weight(p["w1"], p["bn1"], eps)
    w2, b2 = _prep_weight(p["wb1"], p["bnb1"], eps)
    w3, b3 = _prep_weight(p["wb2"], p["bnb2"], eps)
    bias = jnp.stack([b1, b2, b3], axis=1)                 # (Cout, 3), single DMA

    kernel = functools.partial(_fused_client_kernel, H=H, W=W)
    rep = lambda t: (0, 0)   # replicated blocks (weights / biases)

    out = pl.pallas_call(
        kernel,
        out_shape=jax.ShapeDtypeStruct((Cout, n_pad * HW), jnp.float32),
        grid_spec=pltpu.PrefetchScalarGridSpec(
            num_scalar_prefetch=0,
            grid=(num_tiles,),                  # batch tiles; parallel -> 2 TCs on v7x
            in_specs=[
                pl.BlockSpec((_CPAD, L), lambda t: (0, t)),
                pl.BlockSpec((Cout, _K), rep),
                pl.BlockSpec((Cout, _K), rep),
                pl.BlockSpec((Cout, _K), rep),
                pl.BlockSpec((Cout, 3), rep),
            ],
            out_specs=pl.BlockSpec((Cout, L), lambda t: (0, t)),
        ),
        compiler_params=pltpu.CompilerParams(
            dimension_semantics=("parallel",)),
    )(x, w1, w2, w3, bias)

    # (Cout, N*HW) -> (N, Cout, H, W); tiny boundary transpose.
    out = jnp.transpose(out.reshape(Cout, n_pad, HW), (1, 0, 2))[:N]
    return out.reshape(N, Cout, H, W)


# ---------------------------------------------------------------------------
# Deterministic parameter init (mirrors the PyTorch module's shapes/init)
# ---------------------------------------------------------------------------
def kaiming_normal(key, shape):
    cout, cin, kh, kw = shape
    fan_in = cin * kh * kw                      # nn.init.kaiming_normal_ default
    std = (2.0 / fan_in) ** 0.5
    return std * jax.random.normal(key, shape, jnp.float32)


def init_params(key):
    ks = jax.random.split(key, 15)

    def bn_params(k0, k1, k2, k3, c):
        return dict(gamma=1.0 + 0.1 * jax.random.normal(k0, (c,)),
                    beta=0.1 * jax.random.normal(k1, (c,)),
                    mean=0.1 * jax.random.normal(k2, (c,)),
                    var=1.0 + 0.1 * jax.random.uniform(k3, (c,)))

    return {
        "w1": kaiming_normal(ks[0], (16, 3, 3, 3)),
        "bn1": bn_params(ks[1], ks[2], ks[3], ks[4], 16),
        "wb1": kaiming_normal(ks[5], (16, 16, 3, 3)),
        "bnb1": bn_params(ks[6], ks[7], ks[8], ks[9], 16),
        "wb2": kaiming_normal(ks[10], (16, 16, 3, 3)),
        "bnb2": bn_params(ks[11], ks[12], ks[13], ks[14], 16),
    }


# ---------------------------------------------------------------------------
# Pure-JAX reference (bf16-operand / f32-accumulate convs, f32 BatchNorm)
# ---------------------------------------------------------------------------
def reference_forward(x_nchw, p, *, eps=1e-5):
    def conv_bn_relu(x, w, bn, residual=None):
        y = jax.lax.conv_general_dilated(
            x.astype(jnp.bfloat16), w.astype(jnp.bfloat16),
            window_strides=(1, 1), padding=((1, 1), (1, 1)),
            dimension_numbers=("NCHW", "OIHW", "NCHW"),
            preferred_element_type=jnp.float32)
        inv_std = 1.0 / jnp.sqrt(bn["var"] + eps)
        scale = (bn["gamma"] * inv_std).reshape(1, -1, 1, 1)
        bias = (bn["beta"] - bn["mean"] * bn["gamma"] * inv_std).reshape(1, -1, 1, 1)
        y = y * scale + bias
        if residual is not None:
            y = y + residual
        return jnp.maximum(y, 0.0)

    a1 = conv_bn_relu(x_nchw, p["w1"], p["bn1"])
    a2 = conv_bn_relu(a1, p["wb1"], p["bnb1"])
    return conv_bn_relu(a2, p["wb2"], p["bnb2"], residual=a1)


if __name__ == "__main__":
    key = jax.random.PRNGKey(0)
    kx, kp = jax.random.split(key)
    # CIFAR-like small input: batch=2, 3 channels, 16x16 spatial (NCHW).
    x = jax.random.normal(kx, (2, 3, 16, 16), jnp.float32)
    params = init_params(kp)

    out = jax.jit(resnet20_client_forward)(x, params)
    out = jax.block_until_ready(out)
    assert out.shape == (2, 16, 16, 16) and out.dtype == jnp.float32

    ref = jax.block_until_ready(reference_forward(x, params))
    max_err = float(jnp.max(jnp.abs(out - ref)))
    assert max_err < 5e-2, f"max abs error vs reference: {max_err}"

    print("KERNEL_OK")
</pallas_src>

<mosaic_0001>
module attributes {stable_mosaic.version = 11 : i64} {
  func.func @_fused_client_kernel(%arg0: i32, %arg1: memref<16x256xbf16, #tpu.memory_space<vmem>>, %arg2: memref<16x144xbf16, #tpu.memory_space<vmem>>, %arg3: memref<16x144xbf16, #tpu.memory_space<vmem>>, %arg4: memref<16x144xbf16, #tpu.memory_space<vmem>>, %arg5: memref<16x3xf32, #tpu.memory_space<vmem>>, %arg6: memref<16x256xf32, #tpu.memory_space<vmem>>) attributes {dimension_semantics = [#tpu.dimension_semantics<parallel>], iteration_bounds = array<i64: 2>, scalar_prefetch = 0 : i64, scratch_operands = 0 : i64, tpu.core_type = #tpu.core_type<tc>, window_params = [{transform_indices = @transform_0, window_bounds = array<i64: 16, 256>}, {pipeline_mode = #tpu.pipeline_mode<synchronous>, transform_indices = @transform_1, window_bounds = array<i64: 16, 144>}, {pipeline_mode = #tpu.pipeline_mode<synchronous>, transform_indices = @transform_2, window_bounds = array<i64: 16, 144>}, {pipeline_mode = #tpu.pipeline_mode<synchronous>, transform_indices = @transform_3, window_bounds = array<i64: 16, 144>}, {pipeline_mode = #tpu.pipeline_mode<synchronous>, transform_indices = @transform_4, window_bounds = array<i64: 16, 3>}, {transform_indices = @transform_5, window_bounds = array<i64: 16, 256>}]} {
    %0 = tpu.iota {dimensions = array<i32: 1>} : vector<1x256xi32>
    %c255_i32 = arith.constant 255 : i32
    %1 = vector.broadcast %c255_i32 : i32 to vector<1x256xi32>
    %2 = arith.andi %0, %1 : vector<1x256xi32>
    %c15_i32 = arith.constant 15 : i32
    %3 = vector.broadcast %c15_i32 : i32 to vector<1x256xi32>
    %4 = arith.andi %2, %3 : vector<1x256xi32>
    %c-16_i32 = arith.constant -16 : i32
    %5 = vector.broadcast %c-16_i32 : i32 to vector<1x256xi32>
    %6 = arith.addi %2, %5 : vector<1x256xi32>
    %c0_i32 = arith.constant 0 : i32
    %7 = vector.broadcast %c0_i32 : i32 to vector<1x256xi32>
    %8 = arith.cmpi sge, %6, %7 : vector<1x256xi32>
    %c256_i32 = arith.constant 256 : i32
    %9 = vector.broadcast %c256_i32 : i32 to vector<1x256xi32>
    %10 = arith.cmpi slt, %6, %9 : vector<1x256xi32>
    %11 = arith.andi %8, %10 : vector<1x256xi1>
    %c-1_i32 = arith.constant -1 : i32
    %12 = vector.broadcast %c-1_i32 : i32 to vector<1x256xi32>
    %13 = arith.addi %4, %12 : vector<1x256xi32>
    %c0_i32_0 = arith.constant 0 : i32
    %14 = vector.broadcast %c0_i32_0 : i32 to vector<1x256xi32>
    %15 = arith.cmpi sge, %13, %14 : vector<1x256xi32>
    %16 = arith.andi %11, %15 : vector<1x256xi1>
    %c-1_i32_1 = arith.constant -1 : i32
    %17 = vector.broadcast %c-1_i32_1 : i32 to vector<1x256xi32>
    %18 = arith.addi %4, %17 : vector<1x256xi32>
    %c16_i32 = arith.constant 16 : i32
    %19 = vector.broadcast %c16_i32 : i32 to vector<1x256xi32>
    %20 = arith.cmpi slt, %18, %19 : vector<1x256xi32>
    %21 = arith.andi %16, %20 : vector<1x256xi1>
    %c-16_i32_2 = arith.constant -16 : i32
    %22 = vector.broadcast %c-16_i32_2 : i32 to vector<1x256xi32>
    %23 = arith.addi %2, %22 : vector<1x256xi32>
    %c0_i32_3 = arith.constant 0 : i32
    %24 = vector.broadcast %c0_i32_3 : i32 to vector<1x256xi32>
    %25 = arith.cmpi sge, %23, %24 : vector<1x256xi32>
    %c256_i32_4 = arith.constant 256 : i32
    %26 = vector.broadcast %c256_i32_4 : i32 to vector<1x256xi32>
    %27 = arith.cmpi slt, %23, %26 : vector<1x256xi32>
    %28 = arith.andi %25, %27 : vector<1x256xi1>
    %c0_i32_5 = arith.constant 0 : i32
    %29 = vector.broadcast %c0_i32_5 : i32 to vector<1x256xi32>
    %30 = arith.addi %4, %29 : vector<1x256xi32>
    %c0_i32_6 = arith.constant 0 : i32
    %31 = vector.broadcast %c0_i32_6 : i32 to vector<1x256xi32>
    %32 = arith.cmpi sge, %30, %31 : vector<1x256xi32>
    %33 = arith.andi %28, %32 : vector<1x256xi1>
    %c0_i32_7 = arith.constant 0 : i32
    %34 = vector.broadcast %c0_i32_7 : i32 to vector<1x256xi32>
    %35 = arith.addi %4, %34 : vector<1x256xi32>
    %c16_i32_8 = arith.constant 16 : i32
    %36 = vector.broadcast %c16_i32_8 : i32 to vector<1x256xi32>
    %37 = arith.cmpi slt, %35, %36 : vector<1x256xi32>
    %38 = arith.andi %33, %37 : vector<1x256xi1>
    %c-16_i32_9 = arith.constant -16 : i32
    %39 = vector.broadcast %c-16_i32_9 : i32 to vector<1x256xi32>
    %40 = arith.addi %2, %39 : vector<1x256xi32>
    %c0_i32_10 = arith.constant 0 : i32
    %41 = vector.broadcast %c0_i32_10 : i32 to vector<1x256xi32>
    %42 = arith.cmpi sge, %40, %41 : vector<1x256xi32>
    %c256_i32_11 = arith.constant 256 : i32
    %43 = vector.broadcast %c256_i32_11 : i32 to vector<1x256xi32>
    %44 = arith.cmpi slt, %40, %43 : vector<1x256xi32>
    %45 = arith.andi %42, %44 : vector<1x256xi1>
    %c1_i32 = arith.constant 1 : i32
    %46 = vector.broadcast %c1_i32 : i32 to vector<1x256xi32>
    %47 = arith.addi %4, %46 : vector<1x256xi32>
    %c0_i32_12 = arith.constant 0 : i32
    %48 = vector.broadcast %c0_i32_12 : i32 to vector<1x256xi32>
    %49 = arith.cmpi sge, %47, %48 : vector<1x256xi32>
    %50 = arith.andi %45, %49 : vector<1x256xi1>
    %c1_i32_13 = arith.constant 1 : i32
    %51 = vector.broadcast %c1_i32_13 : i32 to vector<1x256xi32>
    %52 = arith.addi %4, %51 : vector<1x256xi32>
    %c16_i32_14 = arith.constant 16 : i32
    %53 = vector.broadcast %c16_i32_14 : i32 to vector<1x256xi32>
    %54 = arith.cmpi slt, %52, %53 : vector<1x256xi32>
    %55 = arith.andi %50, %54 : vector<1x256xi1>
    %c0_i32_15 = arith.constant 0 : i32
    %56 = vector.broadcast %c0_i32_15 : i32 to vector<1x256xi32>
    %57 = arith.addi %2, %56 : vector<1x256xi32>
    %c0_i32_16 = arith.constant 0 : i32
    %58 = vector.broadcast %c0_i32_16 : i32 to vector<1x256xi32>
    %59 = arith.cmpi sge, %57, %58 : vector<1x256xi32>
    %c256_i32_17 = arith.constant 256 : i32
    %60 = vector.broadcast %c256_i32_17 : i32 to vector<1x256xi32>
    %61 = arith.cmpi slt, %57, %60 : vector<1x256xi32>
    %62 = arith.andi %59, %61 : vector<1x256xi1>
    %c-1_i32_18 = arith.constant -1 : i32
    %63 = vector.broadcast %c-1_i32_18 : i32 to vector<1x256xi32>
    %64 = arith.addi %4, %63 : vector<1x256xi32>
    %c0_i32_19 = arith.constant 0 : i32
    %65 = vector.broadcast %c0_i32_19 : i32 to vector<1x256xi32>
    %66 = arith.cmpi sge, %64, %65 : vector<1x256xi32>
    %67 = arith.andi %62, %66 : vector<1x256xi1>
    %c-1_i32_20 = arith.constant -1 : i32
    %68 = vector.broadcast %c-1_i32_20 : i32 to vector<1x256xi32>
    %69 = arith.addi %4, %68 : vector<1x256xi32>
    %c16_i32_21 = arith.constant 16 : i32
    %70 = vector.broadcast %c16_i32_21 : i32 to vector<1x256xi32>
    %71 = arith.cmpi slt, %69, %70 : vector<1x256xi32>
    %72 = arith.andi %67, %71 : vector<1x256xi1>
    %c0_i32_22 = arith.constant 0 : i32
    %73 = vector.broadcast %c0_i32_22 : i32 to vector<1x256xi32>
    %74 = arith.addi %2, %73 : vector<1x256xi32>
    %c0_i32_23 = arith.constant 0 : i32
    %75 = vector.broadcast %c0_i32_23 : i32 to vector<1x256xi32>
    %76 = arith.cmpi sge, %74, %75 : vector<1x256xi32>
    %c256_i32_24 = arith.constant 256 : i32
    %77 = vector.broadcast %c256_i32_24 : i32 to vector<1x256xi32>
    %78 = arith.cmpi slt, %74, %77 : vector<1x256xi32>
    %79 = arith.andi %76, %78 : vector<1x256xi1>
    %c0_i32_25 = arith.constant 0 : i32
    %80 = vector.broadcast %c0_i32_25 : i32 to vector<1x256xi32>
    %81 = arith.addi %4, %80 : vector<1x256xi32>
    %c0_i32_26 = arith.constant 0 : i32
    %82 = vector.broadcast %c0_i32_26 : i32 to vector<1x256xi32>
    %83 = arith.cmpi sge, %81, %82 : vector<1x256xi32>
    %84 = arith.andi %79, %83 : vector<1x256xi1>
    %c0_i32_27 = arith.constant 0 : i32
    %85 = vector.broadcast %c0_i32_27 : i32 to vector<1x256xi32>
    %86 = arith.addi %4, %85 : vector<1x256xi32>
    %c16_i32_28 = arith.constant 16 : i32
    %87 = vector.broadcast %c16_i32_28 : i32 to vector<1x256xi32>
    %88 = arith.cmpi slt, %86, %87 : vector<1x256xi32>
    %89 = arith.andi %84, %88 : vector<1x256xi1>
    %c0_i32_29 = arith.constant 0 : i32
    %90 = vector.broadcast %c0_i32_29 : i32 to vector<1x256xi32>
    %91 = arith.addi %2, %90 : vector<1x256xi32>
    %c0_i32_30 = arith.constant 0 : i32
    %92 = vector.broadcast %c0_i32_30 : i32 to vector<1x256xi32>
    %93 = arith.cmpi sge, %91, %92 : vector<1x256xi32>
    %c256_i32_31 = arith.constant 256 : i32
    %94 = vector.broadcast %c256_i32_31 : i32 to vector<1x256xi32>
    %95 = arith.cmpi slt, %91, %94 : vector<1x256xi32>
    %96 = arith.andi %93, %95 : vector<1x256xi1>
    %c1_i32_32 = arith.constant 1 : i32
    %97 = vector.broadcast %c1_i32_32 : i32 to vector<1x256xi32>
    %98 = arith.addi %4, %97 : vector<1x256xi32>
    %c0_i32_33 = arith.constant 0 : i32
    %99 = vector.broadcast %c0_i32_33 : i32 to vector<1x256xi32>
    %100 = arith.cmpi sge, %98, %99 : vector<1x256xi32>
    %101 = arith.andi %96, %100 : vector<1x256xi1>
    %c1_i32_34 = arith.constant 1 : i32
    %102 = vector.broadcast %c1_i32_34 : i32 to vector<1x256xi32>
    %103 = arith.addi %4, %102 : vector<1x256xi32>
    %c16_i32_35 = arith.constant 16 : i32
    %104 = vector.broadcast %c16_i32_35 : i32 to vector<1x256xi32>
    %105 = arith.cmpi slt, %103, %104 : vector<1x256xi32>
    %106 = arith.andi %101, %105 : vector<1x256xi1>
    %c16_i32_36 = arith.constant 16 : i32
    %107 = vector.broadcast %c16_i32_36 : i32 to vector<1x256xi32>
    %108 = arith.addi %2, %107 : vector<1x256xi32>
    %c0_i32_37 = arith.constant 0 : i32
    %109 = vector.broadcast %c0_i32_37 : i32 to vector<1x256xi32>
    %110 = arith.cmpi sge, %108, %109 : vector<1x256xi32>
    %c256_i32_38 = arith.constant 256 : i32
    %111 = vector.broadcast %c256_i32_38 : i32 to vector<1x256xi32>
    %112 = arith.cmpi slt, %108, %111 : vector<1x256xi32>
    %113 = arith.andi %110, %112 : vector<1x256xi1>
    %c-1_i32_39 = arith.constant -1 : i32
    %114 = vector.broadcast %c-1_i32_39 : i32 to vector<1x256xi32>
    %115 = arith.addi %4, %114 : vector<1x256xi32>
    %c0_i32_40 = arith.constant 0 : i32
    %116 = vector.broadcast %c0_i32_40 : i32 to vector<1x256xi32>
    %117 = arith.cmpi sge, %115, %116 : vector<1x256xi32>
    %118 = arith.andi %113, %117 : vector<1x256xi1>
    %c-1_i32_41 = arith.constant -1 : i32
    %119 = vector.broadcast %c-1_i32_41 : i32 to vector<1x256xi32>
    %120 = arith.addi %4, %119 : vector<1x256xi32>
    %c16_i32_42 = arith.constant 16 : i32
    %121 = vector.broadcast %c16_i32_42 : i32 to vector<1x256xi32>
    %122 = arith.cmpi slt, %120, %121 : vector<1x256xi32>
    %123 = arith.andi %118, %122 : vector<1x256xi1>
    %c16_i32_43 = arith.constant 16 : i32
    %124 = vector.broadcast %c16_i32_43 : i32 to vector<1x256xi32>
    %125 = arith.addi %2, %124 : vector<1x256xi32>
    %c0_i32_44 = arith.constant 0 : i32
    %126 = vector.broadcast %c0_i32_44 : i32 to vector<1x256xi32>
    %127 = arith.cmpi sge, %125, %126 : vector<1x256xi32>
    %c256_i32_45 = arith.constant 256 : i32
    %128 = vector.broadcast %c256_i32_45 : i32 to vector<1x256xi32>
    %129 = arith.cmpi slt, %125, %128 : vector<1x256xi32>
    %130 = arith.andi %127, %129 : vector<1x256xi1>
    %c0_i32_46 = arith.constant 0 : i32
    %131 = vector.broadcast %c0_i32_46 : i32 to vector<1x256xi32>
    %132 = arith.addi %4, %131 : vector<1x256xi32>
    %c0_i32_47 = arith.constant 0 : i32
    %133 = vector.broadcast %c0_i32_47 : i32 to vector<1x256xi32>
    %134 = arith.cmpi sge, %132, %133 : vector<1x256xi32>
    %135 = arith.andi %130, %134 : vector<1x256xi1>
    %c0_i32_48 = arith.constant 0 : i32
    %136 = vector.broadcast %c0_i32_48 : i32 to vector<1x256xi32>
    %137 = arith.addi %4, %136 : vector<1x256xi32>
    %c16_i32_49 = arith.constant 16 : i32
    %138 = vector.broadcast %c16_i32_49 : i32 to vector<1x256xi32>
    %139 = arith.cmpi slt, %137, %138 : vector<1x256xi32>
    %140 = arith.andi %135, %139 : vector<1x256xi1>
    %c16_i32_50 = arith.constant 16 : i32
    %141 = vector.broadcast %c16_i32_50 : i32 to vector<1x256xi32>
    %142 = arith.addi %2, %141 : vector<1x256xi32>
    %c0_i32_51 = arith.constant 0 : i32
    %143 = vector.broadcast %c0_i32_51 : i32 to vector<1x256xi32>
    %144 = arith.cmpi sge, %142, %143 : vector<1x256xi32>
    %c256_i32_52 = arith.constant 256 : i32
    %145 = vector.broadcast %c256_i32_52 : i32 to vector<1x256xi32>
    %146 = arith.cmpi slt, %142, %145 : vector<1x256xi32>
    %147 = arith.andi %144, %146 : vector<1x256xi1>
    %c1_i32_53 = arith.constant 1 : i32
    %148 = vector.broadcast %c1_i32_53 : i32 to vector<1x256xi32>
    %149 = arith.addi %4, %148 : vector<1x256xi32>
    %c0_i32_54 = arith.constant 0 : i32
    %150 = vector.broadcast %c0_i32_54 : i32 to vector<1x256xi32>
    %151 = arith.cmpi sge, %149, %150 : vector<1x256xi32>
    %152 = arith.andi %147, %151 : vector<1x256xi1>
    %c1_i32_55 = arith.constant 1 : i32
    %153 = vector.broadcast %c1_i32_55 : i32 to vector<1x256xi32>
    %154 = arith.addi %4, %153 : vector<1x256xi32>
    %c16_i32_56 = arith.constant 16 : i32
    %155 = vector.broadcast %c16_i32_56 : i32 to vector<1x256xi32>
    %156 = arith.cmpi slt, %154, %155 : vector<1x256xi32>
    %157 = arith.andi %152, %156 : vector<1x256xi1>
    %c0 = arith.constant 0 : index
    %c0_57 = arith.constant 0 : index
    %158 = vector.load %arg1[%c0, %c0_57] : memref<16x256xbf16, #tpu.memory_space<vmem>>, vector<16x256xbf16>
    %c0_58 = arith.constant 0 : index
    %c0_59 = arith.constant 0 : index
    %159 = vector.load %arg2[%c0_58, %c0_59] : memref<16x144xbf16, #tpu.memory_space<vmem>>, vector<16x144xbf16>
    %160 = vector.extract_strided_slice %158 {offsets = [0, 239], sizes = [16, 17], strides = [1, 1]} : vector<16x256xbf16> to vector<16x17xbf16>
    %161 = vector.extract_strided_slice %158 {offsets = [0, 0], sizes = [16, 239], strides = [1, 1]} : vector<16x256xbf16> to vector<16x239xbf16>
    %162 = tpu.concatenate %160, %161 in 1 : vector<16x17xbf16>, vector<16x239xbf16> -> vector<16x256xbf16>
    %cst = arith.constant 0.000000e+00 : bf16
    %163 = vector.shape_cast %21 : vector<1x256xi1> to vector<1x256xi1>
    %164 = vector.broadcast %163 : vector<1x256xi1> to vector<16x256xi1>
    %165 = vector.broadcast %cst : bf16 to vector<16x256xbf16>
    %166 = arith.select %164, %162, %165 : vector<16x256xi1>, vector<16x256xbf16>
    %167 = vector.extract_strided_slice %158 {offsets = [0, 240], sizes = [16, 16], strides = [1, 1]} : vector<16x256xbf16> to vector<16x16xbf16>
    %168 = vector.extract_strided_slice %158 {offsets = [0, 0], sizes = [16, 240], strides = [1, 1]} : vector<16x256xbf16> to vector<16x240xbf16>
    %169 = tpu.concatenate %167, %168 in 1 : vector<16x16xbf16>, vector<16x240xbf16> -> vector<16x256xbf16>
    %cst_60 = arith.constant 0.000000e+00 : bf16
    %170 = vector.shape_cast %38 : vector<1x256xi1> to vector<1x256xi1>
    %171 = vector.broadcast %170 : vector<1x256xi1> to vector<16x256xi1>
    %172 = vector.broadcast %cst_60 : bf16 to vector<16x256xbf16>
    %173 = arith.select %171, %169, %172 : vector<16x256xi1>, vector<16x256xbf16>
    %174 = vector.extract_strided_slice %158 {offsets = [0, 241], sizes = [16, 15], strides = [1, 1]} : vector<16x256xbf16> to vector<16x15xbf16>
    %175 = vector.extract_strided_slice %158 {offsets = [0, 0], sizes = [16, 241], strides = [1, 1]} : vector<16x256xbf16> to vector<16x241xbf16>
    %176 = tpu.concatenate %174, %175 in 1 : vector<16x15xbf16>, vector<16x241xbf16> -> vector<16x256xbf16>
    %cst_61 = arith.constant 0.000000e+00 : bf16
    %177 = vector.shape_cast %55 : vector<1x256xi1> to vector<1x256xi1>
    %178 = vector.broadcast %177 : vector<1x256xi1> to vector<16x256xi1>
    %179 = vector.broadcast %cst_61 : bf16 to vector<16x256xbf16>
    %180 = arith.select %178, %176, %179 : vector<16x256xi1>, vector<16x256xbf16>
    %181 = vector.extract_strided_slice %158 {offsets = [0, 255], sizes = [16, 1], strides = [1, 1]} : vector<16x256xbf16> to vector<16x1xbf16>
    %182 = vector.extract_strided_slice %158 {offsets = [0, 0], sizes = [16, 255], strides = [1, 1]} : vector<16x256xbf16> to vector<16x255xbf16>
    %183 = tpu.concatenate %181, %182 in 1 : vector<16x1xbf16>, vector<16x255xbf16> -> vector<16x256xbf16>
    %cst_62 = arith.constant 0.000000e+00 : bf16
    %184 = vector.shape_cast %72 : vector<1x256xi1> to vector<1x256xi1>
    %185 = vector.broadcast %184 : vector<1x256xi1> to vector<16x256xi1>
    %186 = vector.broadcast %cst_62 : bf16 to vector<16x256xbf16>
    %187 = arith.select %185, %183, %186 : vector<16x256xi1>, vector<16x256xbf16>
    %cst_63 = arith.constant 0.000000e+00 : bf16
    %188 = vector.shape_cast %89 : vector<1x256xi1> to vector<1x256xi1>
    %189 = vector.broadcast %188 : vector<1x256xi1> to vector<16x256xi1>
    %190 = vector.broadcast %cst_63 : bf16 to vector<16x256xbf16>
    %191 = arith.select %189, %158, %190 : vector<16x256xi1>, vector<16x256xbf16>
    %192 = vector.extract_strided_slice %158 {offsets = [0, 1], sizes = [16, 255], strides = [1, 1]} : vector<16x256xbf16> to vector<16x255xbf16>
    %193 = vector.extract_strided_slice %158 {offsets = [0, 0], sizes = [16, 1], strides = [1, 1]} : vector<16x256xbf16> to vector<16x1xbf16>
    %194 = tpu.concatenate %192, %193 in 1 : vector<16x255xbf16>, vector<16x1xbf16> -> vector<16x256xbf16>
    %cst_64 = arith.constant 0.000000e+00 : bf16
    %195 = vector.shape_cast %106 : vector<1x256xi1> to vector<1x256xi1>
    %196 = vector.broadcast %195 : vector<1x256xi1> to vector<16x256xi1>
    %197 = vector.broadcast %cst_64 : bf16 to vector<16x256xbf16>
    %198 = arith.select %196, %194, %197 : vector<16x256xi1>, vector<16x256xbf16>
    %199 = vector.extract_strided_slice %158 {offsets = [0, 15], sizes = [16, 241], strides = [1, 1]} : vector<16x256xbf16> to vector<16x241xbf16>
    %200 = vector.extract_strided_slice %158 {offsets = [0, 0], sizes = [16, 15], strides = [1, 1]} : vector<16x256xbf16> to vector<16x15xbf16>
    %201 = tpu.concatenate %199, %200 in 1 : vector<16x241xbf16>, vector<16x15xbf16> -> vector<16x256xbf16>
    %cst_65 = arith.constant 0.000000e+00 : bf16
    %202 = vector.shape_cast %123 : vector<1x256xi1> to vector<1x256xi1>
    %203 = vector.broadcast %202 : vector<1x256xi1> to vector<16x256xi1>
    %204 = vector.broadcast %cst_65 : bf16 to vector<16x256xbf16>
    %205 = arith.select %203, %201, %204 : vector<16x256xi1>, vector<16x256xbf16>
    %206 = vector.extract_strided_slice %158 {offsets = [0, 16], sizes = [16, 240], strides = [1, 1]} : vector<16x256xbf16> to vector<16x240xbf16>
    %207 = vector.extract_strided_slice %158 {offsets = [0, 0], sizes = [16, 16], strides = [1, 1]} : vector<16x256xbf16> to vector<16x16xbf16>
    %208 = tpu.concatenate %206, %207 in 1 : vector<16x240xbf16>, vector<16x16xbf16> -> vector<16x256xbf16>
    %cst_66 = arith.constant 0.000000e+00 : bf16
    %209 = vector.shape_cast %140 : vector<1x256xi1> to vector<1x256xi1>
    %210 = vector.broadcast %209 : vector<1x256xi1> to vector<16x256xi1>
    %211 = vector.broadcast %cst_66 : bf16 to vector<16x256xbf16>
    %212 = arith.select %210, %208, %211 : vector<16x256xi1>, vector<16x256xbf16>
    %213 = vector.extract_strided_slice %158 {offsets = [0, 17], sizes = [16, 239], strides = [1, 1]} : vector<16x256xbf16> to vector<16x239xbf16>
    %214 = vector.extract_strided_slice %158 {offsets = [0, 0], sizes = [16, 17], strides = [1, 1]} : vector<16x256xbf16> to vector<16x17xbf16>
    %215 = tpu.concatenate %213, %214 in 1 : vector<16x239xbf16>, vector<16x17xbf16> -> vector<16x256xbf16>
    %cst_67 = arith.constant 0.000000e+00 : bf16
    %216 = vector.shape_cast %157 : vector<1x256xi1> to vector<1x256xi1>
    %217 = vector.broadcast %216 : vector<1x256xi1> to vector<16x256xi1>
    %218 = vector.broadcast %cst_67 : bf16 to vector<16x256xbf16>
    %219 = arith.select %217, %215, %218 : vector<16x256xi1>, vector<16x256xbf16>
    %220 = tpu.concatenate %166, %173, %180, %187, %191, %198, %205, %212, %219 in 0 : vector<16x256xbf16>, vector<16x256xbf16>, vector<16x256xbf16>, vector<16x256xbf16>, vector<16x256xbf16>, vector<16x256xbf16>, vector<16x256xbf16>, vector<16x256xbf16>, vector<16x256xbf16> -> vector<144x256xbf16>
    %cst_68 = arith.constant dense<0.000000e+00> : vector<16x256xf32>
    %221 = tpu.matmul %159, %220, %cst_68 {dimension_numbers = #tpu.dot_dimension_numbers<[1], [0], [0], [1], [0, 0, 1, 1], [], []>} : vector<16x144xbf16>, vector<144x256xbf16>, vector<16x256xf32> -> vector<16x256xf32>
    %c0_69 = arith.constant 0 : index
    %c0_70 = arith.constant 0 : index
    %222 = vector.load %arg5[%c0_69, %c0_70] : memref<16x3xf32, #tpu.memory_space<vmem>>, vector<16x1xf32>
    %223 = vector.broadcast %222 : vector<16x1xf32> to vector<16x256xf32>
    %224 = arith.addf %221, %223 : vector<16x256xf32>
    %cst_71 = arith.constant 0.000000e+00 : f32
    %225 = vector.broadcast %cst_71 : f32 to vector<16x256xf32>
    %226 = arith.maximumf %224, %225 : vector<16x256xf32>
    %227 = arith.truncf %226 : vector<16x256xf32> to vector<16x256xbf16>
    %c0_72 = arith.constant 0 : index
    %c0_73 = arith.constant 0 : index
    %228 = vector.load %arg3[%c0_72, %c0_73] : memref<16x144xbf16, #tpu.memory_space<vmem>>, vector<16x144xbf16>
    %229 = vector.extract_strided_slice %227 {offsets = [0, 239], sizes = [16, 17], strides = [1, 1]} : vector<16x256xbf16> to vector<16x17xbf16>
    %230 = vector.extract_strided_slice %227 {offsets = [0, 0], sizes = [16, 239], strides = [1, 1]} : vector<16x256xbf16> to vector<16x239xbf16>
    %231 = tpu.concatenate %229, %230 in 1 : vector<16x17xbf16>, vector<16x239xbf16> -> vector<16x256xbf16>
    %cst_74 = arith.constant 0.000000e+00 : bf16
    %232 = vector.shape_cast %21 : vector<1x256xi1> to vector<1x256xi1>
    %233 = vector.broadcast %232 : vector<1x256xi1> to vector<16x256xi1>
    %234 = vector.broadcast %cst_74 : bf16 to vector<16x256xbf16>
    %235 = arith.select %233, %231, %234 : vector<16x256xi1>, vector<16x256xbf16>
    %236 = vector.extract_strided_slice %227 {offsets = [0, 240], sizes = [16, 16], strides = [1, 1]} : vector<16x256xbf16> to vector<16x16xbf16>
    %237 = vector.extract_strided_slice %227 {offsets = [0, 0], sizes = [16, 240], strides = [1, 1]} : vector<16x256xbf16> to vector<16x240xbf16>
    %238 = tpu.concatenate %236, %237 in 1 : vector<16x16xbf16>, vector<16x240xbf16> -> vector<16x256xbf16>
    %cst_75 = arith.constant 0.000000e+00 : bf16
    %239 = vector.shape_cast %38 : vector<1x256xi1> to vector<1x256xi1>
    %240 = vector.broadcast %239 : vector<1x256xi1> to vector<16x256xi1>
    %241 = vector.broadcast %cst_75 : bf16 to vector<16x256xbf16>
    %242 = arith.select %240, %238, %241 : vector<16x256xi1>, vector<16x256xbf16>
    %243 = vector.extract_strided_slice %227 {offsets = [0, 241], sizes = [16, 15], strides = [1, 1]} : vector<16x256xbf16> to vector<16x15xbf16>
    %244 = vector.extract_strided_slice %227 {offsets = [0, 0], sizes = [16, 241], strides = [1, 1]} : vector<16x256xbf16> to vector<16x241xbf16>
    %245 = tpu.concatenate %243, %244 in 1 : vector<16x15xbf16>, vector<16x241xbf16> -> vector<16x256xbf16>
    %cst_76 = arith.constant 0.000000e+00 : bf16
    %246 = vector.shape_cast %55 : vector<1x256xi1> to vector<1x256xi1>
    %247 = vector.broadcast %246 : vector<1x256xi1> to vector<16x256xi1>
    %248 = vector.broadcast %cst_76 : bf16 to vector<16x256xbf16>
    %249 = arith.select %247, %245, %248 : vector<16x256xi1>, vector<16x256xbf16>
    %250 = vector.extract_strided_slice %227 {offsets = [0, 255], sizes = [16, 1], strides = [1, 1]} : vector<16x256xbf16> to vector<16x1xbf16>
    %251 = vector.extract_strided_slice %227 {offsets = [0, 0], sizes = [16, 255], strides = [1, 1]} : vector<16x256xbf16> to vector<16x255xbf16>
    %252 = tpu.concatenate %250, %251 in 1 : vector<16x1xbf16>, vector<16x255xbf16> -> vector<16x256xbf16>
    %cst_77 = arith.constant 0.000000e+00 : bf16
    %253 = vector.shape_cast %72 : vector<1x256xi1> to vector<1x256xi1>
    %254 = vector.broadcast %253 : vector<1x256xi1> to vector<16x256xi1>
    %255 = vector.broadcast %cst_77 : bf16 to vector<16x256xbf16>
    %256 = arith.select %254, %252, %255 : vector<16x256xi1>, vector<16x256xbf16>
    %cst_78 = arith.constant 0.000000e+00 : bf16
    %257 = vector.shape_cast %89 : vector<1x256xi1> to vector<1x256xi1>
    %258 = vector.broadcast %257 : vector<1x256xi1> to vector<16x256xi1>
    %259 = vector.broadcast %cst_78 : bf16 to vector<16x256xbf16>
    %260 = arith.select %258, %227, %259 : vector<16x256xi1>, vector<16x256xbf16>
    %261 = vector.extract_strided_slice %227 {offsets = [0, 1], sizes = [16, 255], strides = [1, 1]} : vector<16x256xbf16> to vector<16x255xbf16>
    %262 = vector.extract_strided_slice %227 {offsets = [0, 0], sizes = [16, 1], strides = [1, 1]} : vector<16x256xbf16> to vector<16x1xbf16>
    %263 = tpu.concatenate %261, %262 in 1 : vector<16x255xbf16>, vector<16x1xbf16> -> vector<16x256xbf16>
    %cst_79 = arith.constant 0.000000e+00 : bf16
    %264 = vector.shape_cast %106 : vector<1x256xi1> to vector<1x256xi1>
    %265 = vector.broadcast %264 : vector<1x256xi1> to vector<16x256xi1>
    %266 = vector.broadcast %cst_79 : bf16 to vector<16x256xbf16>
    %267 = arith.select %265, %263, %266 : vector<16x256xi1>, vector<16x256xbf16>
    %268 = vector.extract_strided_slice %227 {offsets = [0, 15], sizes = [16, 241], strides = [1, 1]} : vector<16x256xbf16> to vector<16x241xbf16>
    %269 = vector.extract_strided_slice %227 {offsets = [0, 0], sizes = [16, 15], strides = [1, 1]} : vector<16x256xbf16> to vector<16x15xbf16>
    %270 = tpu.concatenate %268, %269 in 1 : vector<16x241xbf16>, vector<16x15xbf16> -> vector<16x256xbf16>
    %cst_80 = arith.constant 0.000000e+00 : bf16
    %271 = vector.shape_cast %123 : vector<1x256xi1> to vector<1x256xi1>
    %272 = vector.broadcast %271 : vector<1x256xi1> to vector<16x256xi1>
    %273 = vector.broadcast %cst_80 : bf16 to vector<16x256xbf16>
    %274 = arith.select %272, %270, %273 : vector<16x256xi1>, vector<16x256xbf16>
    %275 = vector.extract_strided_slice %227 {offsets = [0, 16], sizes = [16, 240], strides = [1, 1]} : vector<16x256xbf16> to vector<16x240xbf16>
    %276 = vector.extract_strided_slice %227 {offsets = [0, 0], sizes = [16, 16], strides = [1, 1]} : vector<16x256xbf16> to vector<16x16xbf16>
    %277 = tpu.concatenate %275, %276 in 1 : vector<16x240xbf16>, vector<16x16xbf16> -> vector<16x256xbf16>
    %cst_81 = arith.constant 0.000000e+00 : bf16
    %278 = vector.shape_cast %140 : vector<1x256xi1> to vector<1x256xi1>
    %279 = vector.broadcast %278 : vector<1x256xi1> to vector<16x256xi1>
    %280 = vector.broadcast %cst_81 : bf16 to vector<16x256xbf16>
    %281 = arith.select %279, %277, %280 : vector<16x256xi1>, vector<16x256xbf16>
    %282 = vector.extract_strided_slice %227 {offsets = [0, 17], sizes = [16, 239], strides = [1, 1]} : vector<16x256xbf16> to vector<16x239xbf16>
    %283 = vector.extract_strided_slice %227 {offsets = [0, 0], sizes = [16, 17], strides = [1, 1]} : vector<16x256xbf16> to vector<16x17xbf16>
    %284 = tpu.concatenate %282, %283 in 1 : vector<16x239xbf16>, vector<16x17xbf16> -> vector<16x256xbf16>
    %cst_82 = arith.constant 0.000000e+00 : bf16
    %285 = vector.shape_cast %157 : vector<1x256xi1> to vector<1x256xi1>
    %286 = vector.broadcast %285 : vector<1x256xi1> to vector<16x256xi1>
    %287 = vector.broadcast %cst_82 : bf16 to vector<16x256xbf16>
    %288 = arith.select %286, %284, %287 : vector<16x256xi1>, vector<16x256xbf16>
    %289 = tpu.concatenate %235, %242, %249, %256, %260, %267, %274, %281, %288 in 0 : vector<16x256xbf16>, vector<16x256xbf16>, vector<16x256xbf16>, vector<16x256xbf16>, vector<16x256xbf16>, vector<16x256xbf16>, vector<16x256xbf16>, vector<16x256xbf16>, vector<16x256xbf16> -> vector<144x256xbf16>
    %cst_83 = arith.constant dense<0.000000e+00> : vector<16x256xf32>
    %290 = tpu.matmul %228, %289, %cst_83 {dimension_numbers = #tpu.dot_dimension_numbers<[1], [0], [0], [1], [0, 0, 1, 1], [], []>} : vector<16x144xbf16>, vector<144x256xbf16>, vector<16x256xf32> -> vector<16x256xf32>
    %c0_84 = arith.constant 0 : index
    %c1 = arith.constant 1 : index
    %291 = vector.load %arg5[%c0_84, %c1] : memref<16x3xf32, #tpu.memory_space<vmem>>, vector<16x1xf32>
    %292 = vector.broadcast %291 : vector<16x1xf32> to vector<16x256xf32>
    %293 = arith.addf %290, %292 : vector<16x256xf32>
    %cst_85 = arith.constant 0.000000e+00 : f32
    %294 = vector.broadcast %cst_85 : f32 to vector<16x256xf32>
    %295 = arith.maximumf %293, %294 : vector<16x256xf32>
    %296 = arith.truncf %295 : vector<16x256xf32> to vector<16x256xbf16>
    %c0_86 = arith.constant 0 : index
    %c0_87 = arith.constant 0 : index
    %297 = vector.load %arg4[%c0_86, %c0_87] : memref<16x144xbf16, #tpu.memory_space<vmem>>, vector<16x144xbf16>
    %298 = vector.extract_strided_slice %296 {offsets = [0, 239], sizes = [16, 17], strides = [1, 1]} : vector<16x256xbf16> to vector<16x17xbf16>
    %299 = vector.extract_strided_slice %296 {offsets = [0, 0], sizes = [16, 239], strides = [1, 1]} : vector<16x256xbf16> to vector<16x239xbf16>
    %300 = tpu.concatenate %298, %299 in 1 : vector<16x17xbf16>, vector<16x239xbf16> -> vector<16x256xbf16>
    %cst_88 = arith.constant 0.000000e+00 : bf16
    %301 = vector.shape_cast %21 : vector<1x256xi1> to vector<1x256xi1>
    %302 = vector.broadcast %301 : vector<1x256xi1> to vector<16x256xi1>
    %303 = vector.broadcast %cst_88 : bf16 to vector<16x256xbf16>
    %304 = arith.select %302, %300, %303 : vector<16x256xi1>, vector<16x256xbf16>
    %305 = vector.extract_strided_slice %296 {offsets = [0, 240], sizes = [16, 16], strides = [1, 1]} : vector<16x256xbf16> to vector<16x16xbf16>
    %306 = vector.extract_strided_slice %296 {offsets = [0, 0], sizes = [16, 240], strides = [1, 1]} : vector<16x256xbf16> to vector<16x240xbf16>
    %307 = tpu.concatenate %305, %306 in 1 : vector<16x16xbf16>, vector<16x240xbf16> -> vector<16x256xbf16>
    %cst_89 = arith.constant 0.000000e+00 : bf16
    %308 = vector.shape_cast %38 : vector<1x256xi1> to vector<1x256xi1>
    %309 = vector.broadcast %308 : vector<1x256xi1> to vector<16x256xi1>
    %310 = vector.broadcast %cst_89 : bf16 to vector<16x256xbf16>
    %311 = arith.select %309, %307, %310 : vector<16x256xi1>, vector<16x256xbf16>
    %312 = vector.extract_strided_slice %296 {offsets = [0, 241], sizes = [16, 15], strides = [1, 1]} : vector<16x256xbf16> to vector<16x15xbf16>
    %313 = vector.extract_strided_slice %296 {offsets = [0, 0], sizes = [16, 241], strides = [1, 1]} : vector<16x256xbf16> to vector<16x241xbf16>
    %314 = tpu.concatenate %312, %313 in 1 : vector<16x15xbf16>, vector<16x241xbf16> -> vector<16x256xbf16>
    %cst_90 = arith.constant 0.000000e+00 : bf16
    %315 = vector.shape_cast %55 : vector<1x256xi1> to vector<1x256xi1>
    %316 = vector.broadcast %315 : vector<1x256xi1> to vector<16x256xi1>
    %317 = vector.broadcast %cst_90 : bf16 to vector<16x256xbf16>
    %318 = arith.select %316, %314, %317 : vector<16x256xi1>, vector<16x256xbf16>
    %319 = vector.extract_strided_slice %296 {offsets = [0, 255], sizes = [16, 1], strides = [1, 1]} : vector<16x256xbf16> to vector<16x1xbf16>
    %320 = vector.extract_strided_slice %296 {offsets = [0, 0], sizes = [16, 255], strides = [1, 1]} : vector<16x256xbf16> to vector<16x255xbf16>
    %321 = tpu.concatenate %319, %320 in 1 : vector<16x1xbf16>, vector<16x255xbf16> -> vector<16x256xbf16>
    %cst_91 = arith.constant 0.000000e+00 : bf16
    %322 = vector.shape_cast %72 : vector<1x256xi1> to vector<1x256xi1>
    %323 = vector.broadcast %322 : vector<1x256xi1> to vector<16x256xi1>
    %324 = vector.broadcast %cst_91 : bf16 to vector<16x256xbf16>
    %325 = arith.select %323, %321, %324 : vector<16x256xi1>, vector<16x256xbf16>
    %cst_92 = arith.constant 0.000000e+00 : bf16
    %326 = vector.shape_cast %89 : vector<1x256xi1> to vector<1x256xi1>
    %327 = vector.broadcast %326 : vector<1x256xi1> to vector<16x256xi1>
    %328 = vector.broadcast %cst_92 : bf16 to vector<16x256xbf16>
    %329 = arith.select %327, %296, %328 : vector<16x256xi1>, vector<16x256xbf16>
    %330 = vector.extract_strided_slice %296 {offsets = [0, 1], sizes = [16, 255], strides = [1, 1]} : vector<16x256xbf16> to vector<16x255xbf16>
    %331 = vector.extract_strided_slice %296 {offsets = [0, 0], sizes = [16, 1], strides = [1, 1]} : vector<16x256xbf16> to vector<16x1xbf16>
    %332 = tpu.concatenate %330, %331 in 1 : vector<16x255xbf16>, vector<16x1xbf16> -> vector<16x256xbf16>
    %cst_93 = arith.constant 0.000000e+00 : bf16
    %333 = vector.shape_cast %106 : vector<1x256xi1> to vector<1x256xi1>
    %334 = vector.broadcast %333 : vector<1x256xi1> to vector<16x256xi1>
    %335 = vector.broadcast %cst_93 : bf16 to vector<16x256xbf16>
    %336 = arith.select %334, %332, %335 : vector<16x256xi1>, vector<16x256xbf16>
    %337 = vector.extract_strided_slice %296 {offsets = [0, 15], sizes = [16, 241], strides = [1, 1]} : vector<16x256xbf16> to vector<16x241xbf16>
    %338 = vector.extract_strided_slice %296 {offsets = [0, 0], sizes = [16, 15], strides = [1, 1]} : vector<16x256xbf16> to vector<16x15xbf16>
    %339 = tpu.concatenate %337, %338 in 1 : vector<16x241xbf16>, vector<16x15xbf16> -> vector<16x256xbf16>
    %cst_94 = arith.constant 0.000000e+00 : bf16
    %340 = vector.shape_cast %123 : vector<1x256xi1> to vector<1x256xi1>
    %341 = vector.broadcast %340 : vector<1x256xi1> to vector<16x256xi1>
    %342 = vector.broadcast %cst_94 : bf16 to vector<16x256xbf16>
    %343 = arith.select %341, %339, %342 : vector<16x256xi1>, vector<16x256xbf16>
    %344 = vector.extract_strided_slice %296 {offsets = [0, 16], sizes = [16, 240], strides = [1, 1]} : vector<16x256xbf16> to vector<16x240xbf16>
    %345 = vector.extract_strided_slice %296 {offsets = [0, 0], sizes = [16, 16], strides = [1, 1]} : vector<16x256xbf16> to vector<16x16xbf16>
    %346 = tpu.concatenate %344, %345 in 1 : vector<16x240xbf16>, vector<16x16xbf16> -> vector<16x256xbf16>
    %cst_95 = arith.constant 0.000000e+00 : bf16
    %347 = vector.shape_cast %140 : vector<1x256xi1> to vector<1x256xi1>
    %348 = vector.broadcast %347 : vector<1x256xi1> to vector<16x256xi1>
    %349 = vector.broadcast %cst_95 : bf16 to vector<16x256xbf16>
    %350 = arith.select %348, %346, %349 : vector<16x256xi1>, vector<16x256xbf16>
    %351 = vector.extract_strided_slice %296 {offsets = [0, 17], sizes = [16, 239], strides = [1, 1]} : vector<16x256xbf16> to vector<16x239xbf16>
    %352 = vector.extract_strided_slice %296 {offsets = [0, 0], sizes = [16, 17], strides = [1, 1]} : vector<16x256xbf16> to vector<16x17xbf16>
    %353 = tpu.concatenate %351, %352 in 1 : vector<16x239xbf16>, vector<16x17xbf16> -> vector<16x256xbf16>
    %cst_96 = arith.constant 0.000000e+00 : bf16
    %354 = vector.shape_cast %157 : vector<1x256xi1> to vector<1x256xi1>
    %355 = vector.broadcast %354 : vector<1x256xi1> to vector<16x256xi1>
    %356 = vector.broadcast %cst_96 : bf16 to vector<16x256xbf16>
    %357 = arith.select %355, %353, %356 : vector<16x256xi1>, vector<16x256xbf16>
    %358 = tpu.concatenate %304, %311, %318, %325, %329, %336, %343, %350, %357 in 0 : vector<16x256xbf16>, vector<16x256xbf16>, vector<16x256xbf16>, vector<16x256xbf16>, vector<16x256xbf16>, vector<16x256xbf16>, vector<16x256xbf16>, vector<16x256xbf16>, vector<16x256xbf16> -> vector<144x256xbf16>
    %cst_97 = arith.constant dense<0.000000e+00> : vector<16x256xf32>
    %359 = tpu.matmul %297, %358, %cst_97 {dimension_numbers = #tpu.dot_dimension_numbers<[1], [0], [0], [1], [0, 0, 1, 1], [], []>} : vector<16x144xbf16>, vector<144x256xbf16>, vector<16x256xf32> -> vector<16x256xf32>
    %c0_98 = arith.constant 0 : index
    %c2 = arith.constant 2 : index
    %360 = vector.load %arg5[%c0_98, %c2] : memref<16x3xf32, #tpu.memory_space<vmem>>, vector<16x1xf32>
    %361 = vector.broadcast %360 : vector<16x1xf32> to vector<16x256xf32>
    %362 = arith.addf %359, %361 : vector<16x256xf32>
    %363 = arith.addf %362, %226 : vector<16x256xf32>
    %cst_99 = arith.constant 0.000000e+00 : f32
    %364 = vector.broadcast %cst_99 : f32 to vector<16x256xf32>
    %365 = arith.maximumf %363, %364 : vector<16x256xf32>
    %c0_100 = arith.constant 0 : index
    %c0_101 = arith.constant 0 : index
    %366 = vector.load %arg6[%c0_100, %c0_101] : memref<16x256xf32, #tpu.memory_space<vmem>>, vector<16x256xf32>
    tpu.vector_store %arg6[%c0_100, %c0_101], %365 {strides = array<i32>} : memref<16x256xf32, #tpu.memory_space<vmem>>, vector<16x256xf32>,
    return
  }
  func.func @transform_0(%arg0: i32) -> (i32, i32) {
    %c0_i32 = arith.constant 0 : i32
    %c0_i32_0 = arith.constant 0 : i32
    return %c0_i32, %arg0 : i32, i32
  }
  func.func @transform_1(%arg0: i32) -> (i32, i32) {
    %c0_i32 = arith.constant 0 : i32
    %c0_i32_0 = arith.constant 0 : i32
    %c0_i32_1 = arith.constant 0 : i32
    return %c0_i32, %c0_i32_0 : i32, i32
  }
  func.func @transform_2(%arg0: i32) -> (i32, i32) {
    %c0_i32 = arith.constant 0 : i32
    %c0_i32_0 = arith.constant 0 : i32
    %c0_i32_1 = arith.constant 0 : i32
    return %c0_i32, %c0_i32_0 : i32, i32
  }
  func.func @transform_3(%arg0: i32) -> (i32, i32) {
    %c0_i32 = arith.constant 0 : i32
    %c0_i32_0 = arith.constant 0 : i32
    %c0_i32_1 = arith.constant 0 : i32
    return %c0_i32, %c0_i32_0 : i32, i32
  }
  func.func @transform_4(%arg0: i32) -> (i32, i32) {
    %c0_i32 = arith.constant 0 : i32
    %c0_i32_0 = arith.constant 0 : i32
    %c0_i32_1 = arith.constant 0 : i32
    return %c0_i32, %c0_i32_0 : i32, i32
  }
  func.func @transform_5(%arg0: i32) -> (i32, i32) {
    %c0_i32 = arith.constant 0 : i32
    %c0_i32_0 = arith.constant 0 : i32
    return %c0_i32, %arg0 : i32, i32
  }
}

</mosaic_0001>

<bundles_post_ra>
// kernel: resnet20_client_forward.1
= control target key start
LH: loop header
LB: loop body
LE: loop exit
PB: predicated region body
PF: predicated region fallthrough
CT: control target
= control target key end

     0   :  { %s1310_s18 = smov 0   ;;  %s1312_s19 = smov 0   ;;  %s1846_s0 = inlined_call_operand.vmem [shape: bf16[16,512], index: 0, kind: input, shape index: {}]   ;;  %s1847_s1 = inlined_call_operand.vmem [shape: bf16[16,144], index: 1, kind: input, shape index: {}]   ;;  %s1848_s2 = inlined_call_operand.vmem [shape: bf16[16,144], index: 2, kind: input, shape index: {}]   ;;  %s1849_s3 = inlined_call_operand.vmem [shape: bf16[16,144], index: 3, kind: input, shape index: {}]   ;;  %s1850_s4 = inlined_call_operand.vmem [shape: f32[16,3], index: 4, kind: input, shape index: {}]   ;;  %s1851_s5 = inlined_call_operand.vmem [shape: f32[16,512], index: 5, kind: output, shape index: {}]  }
   0x1   :  { %s1314_s20 = smov 0  }
   0x2 LB: > { %s1135_s21 = sadd.s32 4294967295, %s1266_s20   ;;  %s1327_s22 = sadd.s32 1, %s1266_s20   ;;  %s1266_s20 = sphi %s1314_s20, %s1978_s20   ;;  %s1262_s19 = sphi %s1312_s19, %s1977_s19   ;;  %s1258_s18 = sphi %s1310_s18, %s1976_s18  }
   0x3   : > { %s19_s23 = ssub.s32 %s1266_s20, %s1327_s22  ;;  %s22_s24 = sadd.s32 1, %s1262_s19 }
   0x4   : > { %p20_p0 = scmp.eq.s32.totalorder %s19_s23, 0  ;;  %p29_p1 = scmp.ne.s32.totalorder %s1262_s19, %s1258_s18 }
   0x5   : > { %p30_p2 = scmp.eq.s32.totalorder %s1266_s20, 0  ;;  %p143_p3 = scmp.eq.s32.totalorder %s1135_s21, 1 }
   0x6   : > { %s1338_s25 = scalar_select %p20_p0, %s1262_s19, %s22_s24  }
   0x7   : > { %p31_p4 = por %p30_p2, %p29_p1  ;;  %p1340_p5 = por %p143_p3, %p29_p1 }
   0x8   : > { %p1138_p6 = scmp.ge.s32.totalorder %s1266_s20, 2 }
   0xa   : > { %177 = sbr.rel (%p1138_p6) target bundleno = 20 (0x14), region = 32 }
   0xf   : > { %180 = sbr.rel (!%p31_p4) target bundleno = 20 (0x14), region = 36  ;;  %s182_s27 = sand.u32 (%p31_p4), 1, %s1262_s19  }
  0x10   : > { %s1189_s28 = sshll.u32 (%p31_p4), %s1266_s20, 3  ;;  %s1139_s29 = sshll.u32 (%p31_p4), %s182_s27, 4 }
  0x11   : > { %s187_s7 = scalar_lea.vmem (%p31_p4), %s1846_s0, %s1189_s28  ;;  %s184_s8 = scalar_lea.vmem (%p31_p4), [#allocation2], %s1139_s29 }
  0x12   : > { %v218_v0 = vld [vmem:[%s187_s7] sm:$0xff] (%p31_p4)  ;;  %v220_v1 = vld [vmem:[%s187_s7 + $0x10] sm:$0xff] (%p31_p4) }
  0x13   : > { %219 = vst [vmem:[%s184_s8] sm:$0xff] (%p31_p4), %v218_v0  ;;  %221 = vst [vmem:[%s184_s8 + $0x8] sm:$0xff] (%p31_p4), %v220_v1 }
  0x14 PF: > { %p1142_p7 = scmp.ge.s32.totalorder %s1266_s20, 1  ;;  %p226_p8 = scmp.lt.s32.totalorder %s1266_s20, 3 }
  0x16   : > { %p227_p9 = pnand %p1142_p7, %p226_p8 }
  0x17   : > { %s233_s9 = sand.u32 (!%p227_p9), 1, %s1258_s18   ;;  %s1269_s12 = smov (!%p227_p9), 113  }
  0x18   : > { %230 = sbr.rel (%p227_p9) target bundleno = 1118 (0x45e), region = 74  ;;  %s1143_s10 = sshll.u32 (!%p227_p9), %s233_s9, 4 }
  0x19   : > { %s235_s11 = scalar_lea.vmem (!%p227_p9), [#allocation2], %s1143_s10  ;;  %s1270_s13 = smov (!%p227_p9), 112  }
  0x1a   : > { %s1272_s14 = smov (!%p227_p9), 127   ;;  %s1273_s15 = smov (!%p227_p9), 1  }
  0x1b   : > { %s1274_s16 = smov (!%p227_p9), 15   ;;  %s1275_s17 = smov (!%p227_p9), 16  }
  0x1c   : > { %s1276_s23 = smov (!%p227_p9), 17   ;;  %s1277_s28 = smov (!%p227_p9), 111  }
  0x1d   : > { %v1268_v2 = vmov 0   ;;  %v345_v3 = vld [vmem:[%s235_s11] sm:$0xff]  ;;  %v346_v4 = vld [vmem:[%s235_s11 + $0x8] sm:$0xff]  ;;  %vm1271_vm0 = vmmov 1   ;;  %vm1852_vm2 = vcmask 130048   ;;  %v264_v15 = vlaneseq  ;;  %s1190_s18 = sshll.u32 (%p1340_p5), %s1135_s21, 4 }
  0x1e   : > { %1227 = vset.pattern.permute.xlu0 %v1268_v2  ;;  %1228 = vset.pattern.permute.xlu1 %v1268_v2  ;;  %v1146_v5 = vcombine.low %v345_v3, %v346_v4  ;;  %v1145_v6 = vcombine.high %v345_v3, %v346_v4  ;;  %vm1361_vm1 = vmpackc.low %vm1271_vm0, %vm1271_vm0  ;;  %v1237_v12 = vld [vmem:[%s1847_s1 + $0x4] ss:$8 sps:$4 sm:$0xff]   ;;  %v1889_v46 = vmov 0  ;;  %v1895_v61 = vmov 0 }
  0x1f   : > { %v1367_v8 = vsel %vm1361_vm1, %v345_v3, 0  ;;  %v1371_v9 = vsel %vm1361_vm1, %v346_v4, 0  ;;  %1159 = vmatprep.mubr.msk.bf16.mxu0 %vm1852_vm2, %v1237_v12  ;;  %v1398_v13 = vld [vmem:[%s1850_s4] sm:$0xff]  ;;  %v1403_v14 = vld [vmem:[%s1850_s4 + $0x8] sm:$0xff]  ;;  %v265_v16 = vand.u32 127, %v264_v15  ;;  %v376_v26 = vshrl.u32 %v264_v15, 7 }
  0x20   : > { %514 = vrot.lane.b32.xlu1 %v1146_v5, %s1269_s12  ;;  %544 = vrot.lane.b32.xlu0 %v1146_v5, %s1270_s13  ;;  %v1148_v10 = vcombine.high %v1367_v8, %v1371_v9  ;;  %v1147_v11 = vcombine.low %v1367_v8, %v1371_v9  ;;  %vm1856_vm2 = vcmask 924672   ;;  %v1897_v62 = vmov 0 }
  0x21   : > { %v266_v17 = vadd.s32 128, %v265_v16  ;;  %v267_v20 = vand.u32 255, %v265_v16  ;;  %v1426_v28 = vsub.s32 0, %v376_v26  ;;  %v1428_v29 = vsub.s32 4, %v376_v26 }
  0x22   : > { %v1923_v58 = vmov 0 }
  0x23   : > { %v268_v18 = vand.u32 255, %v266_v17  ;;  %v269_v23 = vand.u32 15, %v267_v20  ;;  %v271_v38 = vadd.s32 4294967280, %v267_v20 }
  0x24   : > { %516 = vrot.lane.b32.xlu1 %v1145_v6, %s1269_s12  ;;  %546 = vrot.lane.b32.xlu0 %v1145_v6, %s1270_s13 }
  0x25   : > { %v270_v19 = vand.u32 15, %v268_v18  ;;  %v1407_v21 = vadd.s32 16, %v268_v18  ;;  %v1410_v24 = vadd.s32 4294967295, %v269_v23  ;;  %v1419_v27 = vadd.s32 1, %v269_v23 }
  0x27   : > { %v280_v22 = vadd.s32 4294967295, %v270_v19  ;;  %vm1855_vm3 = vcmp.lt.s32.totalorder %v1407_v21, 256  ;;  %v1415_v25 = vadd.s32 1, %v270_v19  ;;  %vm281_vm7 = vcmp.ge.s32.totalorder %v1410_v24, 0 }
  0x28   : > { %486 = vrot.lane.b32.xlu1 %v1145_v6, %s1272_s14  ;;  %484 = vrot.lane.b32.xlu0 %v1146_v5, %s1272_s14  ;;  %vm560_vm9 = vmpackc.low %vm1855_vm3, %vm1271_vm0  ;;  %vm1859_vm13 = vcmp.lt.s32.totalorder %v1419_v27, 16 }
  0x29   : > { %vm282_vm4 = vcmp.ge.s32.totalorder %v280_v22, 0  ;;  %vm286_vm5 = vcmp.lt.s32.totalorder %v280_v22, 16  ;;  %vm1857_vm10 = vcmp.ge.s32.totalorder %v1415_v25, 0  ;;  %vm1853_vm11 = vcmp.lt.s32.totalorder %v1415_v25, 16 }
  0x2a   : > { %vm334_vm6 = vmand %vm1855_vm3, %vm282_vm4  ;;  %v561_v30 = vsel %vm560_vm9, 65537, %v1268_v2 }
  0x2b   : > { %vm336_vm8 = vmand %vm334_vm6, %vm286_vm5  ;;  %v569_v32 = vrot.slane %v561_v30, %v1428_v29  ;;  %v565_v33 = vrot.slane %v561_v30, %v1426_v28  ;;  %vm1854_vm6 = vcmask 916480  }
  0x2c   : > { %449 = vrot.lane.b32.xlu1 %v1146_v5, %s1273_s15  ;;  %447 = vrot.lane.b32.xlu0 %v1145_v6, %s1273_s15  ;;  %vm530_vm12 = vmpackc.low %vm336_vm8, %vm281_vm7 }
  0x2d   : > { %vm1438_vm14 = vmand %vm1857_vm10, %vm1853_vm11  ;;  %v531_v34 = vsel %vm530_vm12, 65537, %v1268_v2  ;;  %vm1457_vm9 = vcmp.ne.s16.totalorder %v569_v32, 0  ;;  %vm1461_vm12 = vcmp.ne.s16.totalorder %v565_v33, 0  ;;  %vm1858_vm11 = vcmask 1039360  }
  0x2e   : > { %vm500_vm15 = vmpackc.low %vm1438_vm14, %vm1859_vm13  ;;  %v539_v37 = vrot.slane %v531_v34, %v1428_v29  ;;  %v535_v43 = vrot.slane %v531_v34, %v1426_v28  ;;  %v1910_v33 = vmov 0 }
  0x2f   : > { %v501_v39 = vsel %vm500_vm15, 65537, %v1268_v2  ;;  %vm1453_vm8 = vmand %vm282_vm4, %vm286_vm5  ;;  %vm273_vm4 = vcmp.ge.s32.totalorder %v271_v38, 0 }
  0x30   : > { %419 = vrot.lane.b32.xlu1 %v1146_v5, %s1274_s16  ;;  %417 = vrot.lane.b32.xlu0 %v1145_v6, %s1274_s16  ;;  %vm1466_vm15 = vcmp.ne.s16.totalorder %v539_v37, 0  ;;  %v509_v49 = vrot.slane %v501_v39, %v1428_v29  ;;  %v505_v50 = vrot.slane %v501_v39, %v1426_v28  ;;  %vm463_vm5 = vmpackc.low %vm1453_vm8, %vm281_vm7 }
  0x31   : > { %v1890_v46 = vsel %vm1466_vm15, 4294967295, %v1889_v46  ;;  %v464_v57 = vsel %vm463_vm5, 65537, %v1268_v2  ;;  %vm1494_vm3 = vmand %vm273_vm4, %vm1859_vm13 }
  0x32   : > { %vm1504_vm10 = vcmp.ne.s16.totalorder %v505_v50, 0  ;;  %vm433_vm5 = vmpackc.low %vm1438_vm14, %vm1494_vm3  ;;  %v472_v4 = vrot.slane %v464_v57, %v1428_v29  ;;  %vm1864_vm3 = vcmask 7168  }
  0x33   : > { %v1898_v62 = vsel %vm1504_vm10, 4294967295, %v1897_v62  ;;  %vm1525_vm13 = vmand %vm273_vm4, %vm281_vm7  ;;  %v434_v12 = vsel %vm433_vm5, 65537, %v1268_v2  ;;  %vm1906_vm5 = vcmp.lt.s32.totalorder %v1407_v21, 256 }
  0x34   : > { %389 = vrot.lane.b32.xlu1 %v1146_v5, %s1275_s17  ;;  %387 = vrot.lane.b32.xlu0 %v1145_v6, %s1275_s17  ;;  %vm1533_vm14 = vcmp.ne.s16.totalorder %v472_v4, 0  ;;  %vm373_vm7 = vmpackc.low %vm1453_vm8, %vm1525_vm13  ;;  %v442_v22 = vrot.slane %v434_v12, %v1428_v29  ;;  %v438_v23 = vrot.slane %v434_v12, %v1426_v28 }
  0x35   : > { %v374_v21 = vsel %vm373_vm7, 65537, %v1268_v2 }
  0x36   : > { %vm1568_vm8 = vcmp.ne.s16.totalorder %v442_v22, 0  ;;  %v378_v37 = vrot.slane %v374_v21, %v1426_v28 }
  0x38   : > { %359 = vrot.lane.b32.xlu1 %v1146_v5, %s1276_s23  ;;  %354 = vrot.lane.b32.xlu0 %v1145_v6, %s1276_s23 }
  0x3c   : > { %576 = vrot.lane.b32.xlu1 %v1145_v6, %s1277_s28  ;;  %574 = vrot.lane.b32.xlu0 %v1146_v5, %s1277_s28  ;;  %v468_v5 = vrot.slane %v464_v57, %v1426_v28 }
  0x40   : > { %618 = vperm.xlu0 %1227, %v1398_v13   ;;  %623 = vperm.xlu1 %1228, %v1403_v14  }
  0x92   : > { %v515_v35 = vpop.permute.xlu1 %514  ;;  %v545_v36 = vpop.permute.xlu0 %544 }
  0x96   : > { %v517_v44 = vpop.permute.xlu1 %516  ;;  %v547_v45 = vpop.permute.xlu0 %546 }
  0x97   : > { %v554_v47 = vsel %vm1854_vm6, %v547_v45, %v545_v36  ;;  %v549_v48 = vsel %vm1854_vm6, %v545_v36, %v547_v45  ;;  %v519_v52 = vsel %vm1856_vm2, %v515_v35, %v517_v44  ;;  %v524_v53 = vsel %vm1856_vm2, %v517_v44, %v515_v35  ;;  %v1243_v45 = vld [vmem:[%s1849_s3] ss:$8 sps:$4 sm:$0xff]  }
  0x98   : > { %1151 = vmatprep.subr.msk.bf16.mxu0 %vm1457_vm9, %v554_v47  ;;  %v572_v51 = vsel %vm1461_vm12, %v549_v48, 0  ;;  %vm1484_vm6 = vcmp.ne.s16.totalorder %v535_v43, 0  ;;  %vm1500_vm2 = vcmp.ne.s16.totalorder %v509_v49, 0  ;;  %v382_v36 = vrot.slane %v374_v21, %v1428_v29 }
  0x99   : > { %639 = vmatpush1.bf16.msra.mxu0 %v572_v51  ;;  %v1896_v61 = vsel %vm1500_vm2, 4294967295, %v1895_v61  ;;  %v542_v63 = vsel %vm1484_vm6, %v519_v52, 0  ;;  %v1921_v47 = vmov 0 }
  0x9a   : > { %1152 = vmatprep.subr.msk.bf16.mxu0 %vm1466_vm15, %v524_v53  ;;  %v487_v55 = vpop.permute.xlu1 %486  ;;  %v485_v56 = vpop.permute.xlu0 %484 }
  0x9b   : > { %v489_v59 = vsel %vm1858_vm11, %v485_v56, %v487_v55  ;;  %v494_v60 = vsel %vm1858_vm11, %v487_v55, %v485_v56  ;;  %vm403_vm11 = vmpackc.low %vm1271_vm0, %vm273_vm4  ;;  %vm1537_vm0 = vcmp.ne.s16.totalorder %v468_v5, 0  ;;  %vm1905_vm4 = vcmp.ge.s32.totalorder %v1415_v25, 0 }
  0x9c   : > { %v512_v0 = vsel %vm1504_vm10, %v489_v59, 0  ;;  %v404_v19 = vsel %vm403_vm11, 65537, %v1268_v2  ;;  %vm342_vm10 = vmand %vm1906_vm5, %vm1905_vm4  ;;  %vm1907_vm11 = vcmp.lt.s32.totalorder %v1415_v25, 16  ;;  %vm1572_vm4 = vcmp.ne.s16.totalorder %v438_v23, 0 }
  0x9d   : > { %641 = vmatpush1.bf16.msra.mxu0 %v542_v63  ;;  %v412_v31 = vrot.slane %v404_v19, %v1428_v29  ;;  %v408_v32 = vrot.slane %v404_v19, %v1426_v28  ;;  %vm344_vm13 = vmand %vm342_vm10, %vm1907_vm11  ;;  %v1911_v33 = vsel %vm1572_vm4, 4294967295, %v1910_v33  ;;  %vm1912_vm5 = vcmp.lt.s32.totalorder %v1419_v27, 16  ;;  %v1235_v63 = vld [vmem:[%s1847_s1] ss:$8 sps:$4 sm:$0xff]  }
  0x9e   : > { %1153 = vmatprep.subr.msk.bf16.mxu0 %vm1500_vm2, %v494_v60  ;;  %v450_v1 = vpop.permute.xlu1 %449  ;;  %v448_v3 = vpop.permute.xlu0 %447  ;;  %vm1865_vm2 = vcmask 121856   ;;  %vm1913_vm10 = vcmask 130048   ;;  %v1917_v27 = vmov 0  ;;  %v1925_v59 = vmov 0 }
  0x9f   : > { %v452_v20 = vsel %vm1864_vm3, %v450_v1, %v448_v3  ;;  %vm1914_vm7 = vmmov %vm1913_vm10  ;;  %vm1586_vm11 = vcmp.ne.s16.totalorder %v412_v31, 0  ;;  %v1278_v31 = vmov 1  }
  0xa0   : > { %1229 = vset.pattern.permute.xlu1 %v1278_v31  ;;  %1230 = vset.pattern.permute.xlu0 %v1278_v31 }
  0xa1   : > { %643 = vmatpush1.bf16.msra.mxu0 %v512_v0 }
  0xa2   : > { %644 = vmatprep.subr.bf16.mxu0 %v1148_v10  ;;  %v420_v17 = vpop.permute.xlu1 %419  ;;  %v418_v18 = vpop.permute.xlu0 %417  ;;  %v457_v10 = vsel %vm1864_vm3, %v448_v3, %v450_v1  ;;  %vm590_vm3 = vmpackc.low %vm344_vm13, %vm1912_vm5  ;;  %vm1590_vm13 = vcmp.ne.s16.totalorder %v408_v32, 0  ;;  %vm1866_vm5 = vcmask 138240  }
  0xa3   : > { %v475_v24 = vsel %vm1537_vm0, %v457_v10, 0  ;;  %v422_v8 = vsel %vm1865_vm2, %v420_v17, %v418_v18  ;;  %v427_v9 = vsel %vm1865_vm2, %v418_v18, %v420_v17  ;;  %v1918_v27 = vsel %vm1590_vm13, 4294967295, %v1917_v27 }
  0xa4   : > { %v445_v25 = vsel %vm1572_vm4, %v427_v9, 0  ;;  %v591_v43 = vsel %vm590_vm3, 65537, %v1268_v2  ;;  %vm1867_vm3 = vcmask 908288  }
  0xa5   : > { %645 = vmatpush1.bf16.msra.mxu0 %v1147_v11  ;;  %v599_v50 = vrot.slane %v591_v43, %v1428_v29  ;;  %v595_v51 = vrot.slane %v591_v43, %v1426_v28 }
  0xa6   : > { %1154 = vmatprep.subr.msk.bf16.mxu0 %vm1533_vm14, %v452_v20  ;;  %v390_v26 = vpop.permute.xlu1 %389  ;;  %v388_v30 = vpop.permute.xlu0 %387 }
  0xa7   : > { %v392_v38 = vsel %vm1913_vm10, %v390_v26, %v388_v30  ;;  %v397_v39 = vsel %vm1914_vm7, %v388_v30, %v390_v26  ;;  %vm1599_vm10 = vcmp.ne.s16.totalorder %v382_v36, 0  ;;  %vm1603_vm7 = vcmp.ne.s16.totalorder %v378_v37, 0  ;;  %v1240_v30 = vld [vmem:[%s1848_s2 + $0x4] ss:$8 sps:$4 sm:$0xff]  }
  0xa8   : > { %v415_v44 = vsel %vm1590_vm13, %v397_v39, 0  ;;  %v1922_v47 = vsel %vm1603_vm7, 4294967295, %v1921_v47  ;;  %vm1617_vm2 = vcmp.ne.s16.totalorder %v599_v50, 0  ;;  %v739_v36 = vsel %vm1361_vm1, 65537, %v1268_v2 }
  0xa9   : > { %647 = vmatpush1.bf16.msra.mxu0 %v475_v24  ;;  %v1924_v58 = vsel %vm1617_vm2, 4294967295, %v1923_v58  ;;  %v747_v39 = vrot.slane %v739_v36, %v1428_v29  ;;  %v1934_v50 = vmov 0 }
  0xaa   : > { %1155 = vmatprep.subr.msk.bf16.mxu0 %vm1568_vm8, %v422_v8  ;;  %v360_v34 = vpop.permute.xlu1 %359  ;;  %v355_v35 = vpop.permute.xlu0 %354 }
  0xab   : > { %v362_v48 = vsel %vm1866_vm5, %v360_v34, %v355_v35  ;;  %v367_v49 = vsel %vm1866_vm5, %v355_v35, %v360_v34  ;;  %vm1621_vm5 = vcmp.ne.s16.totalorder %v595_v51, 0 }
  0xac   : > { %v385_v55 = vsel %vm1603_vm7, %v367_v49, 0  ;;  %v1926_v59 = vsel %vm1621_vm5, 4294967295, %v1925_v59 }
  0xad   : > { %649 = vmatpush1.bf16.msra.mxu0 %v445_v25 }
  0xae   : > { %1156 = vmatprep.subr.msk.bf16.mxu0 %vm1586_vm11, %v392_v38  ;;  %v577_v52 = vpop.permute.xlu1 %576  ;;  %v575_v53 = vpop.permute.xlu0 %574 }
  0xaf   : > { %v579_v56 = vsel %vm1867_vm3, %v575_v53, %v577_v52  ;;  %v584_v57 = vsel %vm1867_vm3, %v577_v52, %v575_v53  ;;  %vm1927_vm3 = vcmask 130048  }
  0xb0   : > { %v602_v60 = vsel %vm1621_vm5, %v579_v56, 0  ;;  %1171 = vmatprep.mubr.msk.bf16.mxu1 %vm1927_vm3, %v1240_v30  ;;  %vm1928_vm5 = vcmask 916480   ;;  %vm1930_vm3 = vcmask 924672  }
  0xb1   : > { %651 = vmatpush1.bf16.msra.mxu0 %v415_v44  ;;  %vm1931_vm7 = vmmov %vm1930_vm3 }
  0xb2   : > { %1157 = vmatprep.subr.msk.bf16.mxu0 %vm1599_vm10, %v362_v48  ;;  %v743_v48 = vrot.slane %v739_v36, %v1426_v28 }
  0xb5   : > { %653 = vmatpush1.bf16.msra.mxu0 %v385_v55 }
  0xb6   : > { %1158 = vmatprep.subr.msk.bf16.mxu0 %vm1617_vm2, %v584_v57  ;;  %vm1929_vm2 = vmmov %vm1928_vm5 }
  0xb9   : > { %669 = vmatpush2.bf16.msra.mxu0 %v602_v60 }
  0xbb   : > { %v619_v1 = vpop.permute.xlu0 %618  ;;  %v624_v4 = vpop.permute.xlu1 %623 }
  0xbc   : > { %671 = vmatmul.mubr.bf16.vlgmr.msra.gmra.mxu0 %v1235_v63 }
 0x17c   : > { %v672_v0 = vpop.f32.mrf.mxu0 }
 0x17d   : > { %v1632_v5 = vadd.f32 %v672_v0, %v619_v1 }
 0x17e   : > { %v674_v3 = vpop.f32.mrf.mxu0 }
 0x17f   : > { %v1634_v12 = vadd.f32 %v674_v3, %v619_v1  ;;  %v681_v19 = vmax.f32 %v1632_v5, 0.0 }
 0x180   : > { %v676_v6 = vpop.f32.mrf.mxu0 }
 0x181   : > { %v1636_v17 = vadd.f32 %v676_v6, %v624_v4  ;;  %v682_v22 = vmax.f32 %v1634_v12, 0.0 }
 0x182   : > { %v678_v18 = vpop.f32.mrf.mxu0 }
 0x183   : > { %v683_v20 = vmax.f32 %v1636_v17, 0.0  ;;  %v1640_v10 = vadd.f32 %v678_v18, %v624_v4 }
 0x185   : > { %v685_v23 = vpack.c.bf16 %v683_v20, %v681_v19  ;;  %v684_v24 = vmax.f32 %v1640_v10, 0.0 }
 0x187   : > { %v686_v26 = vpack.c.bf16 %v684_v24, %v682_v22  ;;  %776 = vrot.lane.b32.xlu1 %v685_v23, %s1270_s13 }
 0x189   : > { %778 = vrot.lane.b32.xlu0 %v686_v26, %s1270_s13 }
 0x18b   : > { %764 = vrot.lane.b32.xlu1 %v685_v23, %s1269_s12 }
 0x18d   : > { %766 = vrot.lane.b32.xlu0 %v686_v26, %s1269_s12 }
 0x18f   : > { %752 = vrot.lane.b32.xlu1 %v685_v23, %s1272_s14 }
 0x191   : > { %754 = vrot.lane.b32.xlu0 %v686_v26, %s1272_s14 }
 0x193   : > { %727 = vrot.lane.b32.xlu1 %v686_v26, %s1273_s15 }
 0x195   : > { %729 = vrot.lane.b32.xlu0 %v685_v23, %s1273_s15 }
 0x197   : > { %715 = vrot.lane.b32.xlu1 %v686_v26, %s1274_s16 }
 0x199   : > { %717 = vrot.lane.b32.xlu0 %v685_v23, %s1274_s16 }
 0x19b   : > { %703 = vrot.lane.b32.xlu1 %v686_v26, %s1275_s17 }
 0x19d   : > { %705 = vrot.lane.b32.xlu0 %v685_v23, %s1275_s17 }
 0x19f   : > { %690 = vrot.lane.b32.xlu1 %v686_v26, %s1276_s23 }
 0x1a1   : > { %693 = vrot.lane.b32.xlu0 %v685_v23, %s1276_s23 }
 0x1a3   : > { %788 = vrot.lane.b32.xlu1 %v685_v23, %s1277_s28 }
 0x1a5   : > { %790 = vrot.lane.b32.xlu0 %v686_v26, %s1277_s28 }
 0x1a7   : > { %801 = vperm.xlu1 %1229, %v1398_v13  }
 0x1a9   : > { %805 = vperm.xlu0 %1230, %v1403_v14  }
 0x1f9   : > { %v777_v32 = vpop.permute.xlu1 %776 }
 0x1fb   : > { %v779_v21 = vpop.permute.xlu0 %778 }
 0x1fc   : > { %v784_v8 = vsel %vm1928_vm5, %v779_v21, %v777_v32  ;;  %v780_v9 = vsel %vm1929_vm2, %v777_v32, %v779_v21  ;;  %vm1932_vm2 = vcmask 1039360   ;;  %vm1693_vm5 = vcmp.ne.s16.totalorder %v747_v39, 0 }
 0x1fd   : > { %1162 = vmatprep.subr.msk.bf16.mxu1 %vm1457_vm9, %v784_v8  ;;  %v765_v25 = vpop.permute.xlu1 %764  ;;  %v786_v34 = vsel %vm1461_vm12, %v780_v9, 0  ;;  %vm1933_vm1 = vmmov %vm1932_vm2  ;;  %v1935_v50 = vsel %vm1693_vm5, 4294967295, %v1934_v50 }
 0x1fe   : > { %821 = vmatpush1.bf16.msra.mxu1 %v786_v34 }
 0x1ff   : > { %v767_v35 = vpop.permute.xlu0 %766 }
 0x200   : > { %v768_v37 = vsel %vm1930_vm3, %v765_v25, %v767_v35  ;;  %v772_v38 = vsel %vm1931_vm7, %v767_v35, %v765_v25  ;;  %vm1936_vm7 = vnez %v1896_v61  ;;  %vm1937_vm3 = vnez %v1898_v62 }
 0x201   : > { %1163 = vmatprep.subr.msk.bf16.mxu1 %vm1466_vm15, %v772_v38  ;;  %v753_v43 = vpop.permute.xlu1 %752  ;;  %v774_v44 = vsel %vm1484_vm6, %v768_v37, 0  ;;  %vm1701_vm15 = vcmp.ne.s16.totalorder %v743_v48, 0  ;;  %v1238_v37 = vld [vmem:[%s1848_s2] ss:$8 sps:$4 sm:$0xff]  }
 0x202   : > { %823 = vmatpush1.bf16.msra.mxu1 %v774_v44  ;;  %v750_v55 = vsel %vm1701_vm15, %v685_v23, 0 }
 0x203   : > { %v755_v49 = vpop.permute.xlu0 %754 }
 0x204   : > { %v756_v7 = vsel %vm1932_vm2, %v753_v43, %v755_v49  ;;  %v760_v2 = vsel %vm1933_vm1, %v755_v49, %v753_v43  ;;  %vm1940_vm2 = vcmask 7168  }
 0x205   : > { %1164 = vmatprep.subr.msk.bf16.mxu1 %vm1936_vm7, %v760_v2  ;;  %v728_v29 = vpop.permute.xlu1 %727  ;;  %v762_v51 = vsel %vm1937_vm3, %v756_v7, 0  ;;  %vm1941_vm1 = vmmov %vm1940_vm2  ;;  %vm1942_vm7 = vcmask 121856  }
 0x206   : > { %825 = vmatpush1.bf16.msra.mxu1 %v762_v51 }
 0x207   : > { %v730_v28 = vpop.permute.xlu0 %729  ;;  %1165 = vmatprep.subr.msk.bf16.mxu1 %vm1693_vm5, %v686_v26  ;;  %vm1943_vm5 = vmmov %vm1942_vm7 }
 0x208   : > { %v731_v56 = vsel %vm1940_vm2, %v730_v28, %v728_v29  ;;  %v735_v57 = vsel %vm1941_vm1, %v728_v29, %v730_v28  ;;  %vm1944_vm2 = vcmask 130048  }
 0x209   : > { %v716_v53 = vpop.permute.xlu1 %715  ;;  %v737_v0 = vsel %vm1537_vm0, %v735_v57, 0  ;;  %vm1945_vm1 = vmmov %vm1944_vm2 }
 0x20a   : > { %827 = vmatpush1.bf16.msra.mxu1 %v750_v55 }
 0x20b   : > { %v718_v60 = vpop.permute.xlu0 %717  ;;  %1166 = vmatprep.subr.msk.bf16.mxu1 %vm1533_vm14, %v731_v56 }
 0x20c   : > { %v719_v1 = vsel %vm1942_vm7, %v718_v60, %v716_v53  ;;  %v723_v3 = vsel %vm1943_vm5, %v716_v53, %v718_v60  ;;  %vm1946_vm5 = vcmask 138240  }
 0x20d   : > { %v704_v63 = vpop.permute.xlu1 %703  ;;  %v725_v6 = vsel %vm1572_vm4, %v723_v3, 0  ;;  %vm1947_vm7 = vmmov %vm1946_vm5 }
 0x20e   : > { %829 = vmatpush1.bf16.msra.mxu1 %v737_v0  ;;  %v1279_v0 = vmov 2  }
 0x20f   : > { %v706_v4 = vpop.permute.xlu0 %705  ;;  %1167 = vmatprep.subr.msk.bf16.mxu1 %vm1568_vm8, %v719_v1  ;;  %1231 = vset.pattern.permute.xlu0 %v1279_v0 }
 0x210   : > { %v707_v18 = vsel %vm1944_vm2, %v706_v4, %v704_v63  ;;  %v711_v23 = vsel %vm1945_vm1, %v704_v63, %v706_v4  ;;  %vm1948_vm2 = vnez %v1922_v47  ;;  %vm1949_vm1 = vcmask 908288   ;;  %v1241_v63 = vld [vmem:[%s1849_s3 + $0x4] ss:$8 sps:$4 sm:$0xff]   ;;  %1232 = vset.pattern.permute.xlu1 %v1279_v0 }
 0x211   : > { %v691_v26 = vpop.permute.xlu1 %690  ;;  %v713_v31 = vsel %vm1590_vm13, %v711_v23, 0  ;;  %vm1950_vm4 = vmmov %vm1949_vm1  ;;  %vm1951_vm13 = vnez %v1924_v58 }
 0x212   : > { %831 = vmatpush1.bf16.msra.mxu1 %v725_v6 }
 0x213   : > { %v694_v30 = vpop.permute.xlu0 %693  ;;  %1168 = vmatprep.subr.msk.bf16.mxu1 %vm1586_vm11, %v707_v18 }
 0x214   : > { %v695_v32 = vsel %vm1946_vm5, %v694_v30, %v691_v26  ;;  %v699_v21 = vsel %vm1947_vm7, %v691_v26, %v694_v30  ;;  %vm1952_vm5 = vnez %v1926_v59  ;;  %vm1954_vm7 = vcmask 916480  }
 0x215   : > { %v789_v9 = vpop.permute.xlu1 %788  ;;  %v701_v25 = vsel %vm1948_vm2, %v699_v21, 0 }
 0x216   : > { %833 = vmatpush1.bf16.msra.mxu1 %v713_v31 }
 0x217   : > { %v791_v8 = vpop.permute.xlu0 %790  ;;  %1169 = vmatprep.subr.msk.bf16.mxu1 %vm1599_vm10, %v695_v32 }
 0x218   : > { %v792_v34 = vsel %vm1949_vm1, %v789_v9, %v791_v8  ;;  %v796_v35 = vsel %vm1950_vm4, %v791_v8, %v789_v9  ;;  %vm1953_vm4 = vcmask 130048   ;;  %vm1955_vm1 = vmmov %vm1954_vm7 }
 0x219   : > { %v798_v36 = vsel %vm1952_vm5, %v792_v34, 0  ;;  %1183 = vmatprep.mubr.msk.bf16.mxu0 %vm1953_vm4, %v1241_v63  ;;  %vm1956_vm4 = vcmask 924672  }
 0x21a   : > { %835 = vmatpush1.bf16.msra.mxu1 %v701_v25  ;;  %vm1957_vm5 = vmmov %vm1956_vm4 }
 0x21b   : > { %1170 = vmatprep.subr.msk.bf16.mxu1 %vm1951_vm13, %v796_v35 }
 0x21e   : > { %851 = vmatpush2.bf16.msra.mxu1 %v798_v36 }
 0x221   : > { %853 = vmatmul.mubr.bf16.vlgmr.msra.gmra.mxu1 %v1238_v37 }
 0x222   : > { %v802_v38 = vpop.permute.xlu1 %801 }
 0x224   : > { %v806_v44 = vpop.permute.xlu0 %805 }
 0x2e1   : > { %v854_v39 = vpop.f32.mrf.mxu1 }
 0x2e2   : > { %v855_v48 = vadd.f32 %v854_v39, %v802_v38 }
 0x2e3   : > { %v856_v43 = vpop.f32.mrf.mxu1 }
 0x2e4   : > { %v863_v29 = vmax.f32 %v855_v48, 0.0  ;;  %v857_v51 = vadd.f32 %v856_v43, %v802_v38 }
 0x2e5   : > { %v858_v49 = vpop.f32.mrf.mxu1 }
 0x2e6   : > { %v859_v7 = vadd.f32 %v858_v49, %v806_v44  ;;  %v864_v57 = vmax.f32 %v857_v51, 0.0 }
 0x2e7   : > { %v860_v2 = vpop.f32.mrf.mxu1 }
 0x2e8   : > { %v865_v28 = vmax.f32 %v859_v7, 0.0  ;;  %v861_v53 = vadd.f32 %v860_v2, %v806_v44 }
 0x2ea   : > { %v867_v55 = vpack.c.bf16 %v865_v28, %v863_v29  ;;  %v866_v56 = vmax.f32 %v861_v53, 0.0 }
 0x2ec   : > { %935 = vrot.lane.b32.xlu0 %v867_v55, %s1269_s12  ;;  %947 = vrot.lane.b32.xlu1 %v867_v55, %s1270_s13  ;;  %v868_v60 = vpack.c.bf16 %v866_v56, %v864_v57 }
 0x2f0   : > { %923 = vrot.lane.b32.xlu0 %v867_v55, %s1272_s14  ;;  %949 = vrot.lane.b32.xlu1 %v868_v60, %s1270_s13 }
 0x2f4   : > { %909 = vrot.lane.b32.xlu0 %v868_v60, %s1273_s15  ;;  %937 = vrot.lane.b32.xlu1 %v868_v60, %s1269_s12 }
 0x2f8   : > { %897 = vrot.lane.b32.xlu0 %v868_v60, %s1274_s16  ;;  %925 = vrot.lane.b32.xlu1 %v868_v60, %s1272_s14 }
 0x2fc   : > { %885 = vrot.lane.b32.xlu0 %v868_v60, %s1275_s17  ;;  %911 = vrot.lane.b32.xlu1 %v867_v55, %s1273_s15  ;;  %s1144_s15 = sshll.u32 %s233_s9, 5 }
 0x300   : > { %872 = vrot.lane.b32.xlu0 %v868_v60, %s1276_s23  ;;  %899 = vrot.lane.b32.xlu1 %v867_v55, %s1274_s16  ;;  %s258_s16 = scalar_lea.vmem [#allocation3], %s1144_s15 }
 0x304   : > { %959 = vrot.lane.b32.xlu0 %v867_v55, %s1277_s28  ;;  %887 = vrot.lane.b32.xlu1 %v867_v55, %s1275_s17 }
 0x308   : > { %875 = vrot.lane.b32.xlu1 %v867_v55, %s1276_s23  ;;  %972 = vperm.xlu0 %1231, %v1398_v13   ;;  %s1055_s23 = scalar_lea.vmem (%p1340_p5), %s1851_s5, %s1190_s18 }
 0x30c   : > { %961 = vrot.lane.b32.xlu1 %v868_v60, %s1277_s28 }
 0x310   : > { %976 = vperm.xlu1 %1232, %v1403_v14  }
 0x35e   : > { %v936_v1 = vpop.permute.xlu0 %935  ;;  %v948_v3 = vpop.permute.xlu1 %947 }
 0x362   : > { %v924_v4 = vpop.permute.xlu0 %923  ;;  %v950_v6 = vpop.permute.xlu1 %949 }
 0x363   : > { %v951_v18 = vsel %vm1954_vm7, %v948_v3, %v950_v6  ;;  %v955_v23 = vsel %vm1955_vm1, %v950_v6, %v948_v3  ;;  %vm1958_vm7 = vnez %v1890_v46  ;;  %vm1959_vm1 = vcmask 1039360  }
 0x364   : > { %v957_v26 = vsel %vm1461_vm12, %v951_v18, 0  ;;  %1174 = vmatprep.subr.msk.bf16.mxu0 %vm1457_vm9, %v955_v23  ;;  %vm1960_vm12 = vmmov %vm1959_vm1  ;;  %vm1961_vm9 = vnez %v1896_v61  ;;  %v921_v46 = vsel %vm1701_vm15, %v867_v55, 0  ;;  %vm1967_vm15 = vnez %v1911_v33 }
 0x365   : > { %992 = vmatpush1.bf16.msra.mxu0 %v957_v26 }
 0x366   : > { %v938_v13 = vpop.permute.xlu1 %937  ;;  %v910_v31 = vpop.permute.xlu0 %909 }
 0x367   : > { %v939_v30 = vsel %vm1956_vm4, %v936_v1, %v938_v13  ;;  %v943_v14 = vsel %vm1957_vm5, %v938_v13, %v936_v1  ;;  %vm1962_vm5 = vnez %v1935_v50 }
 0x368   : > { %v945_v32 = vsel %vm1484_vm6, %v939_v30, 0  ;;  %1175 = vmatprep.subr.msk.bf16.mxu0 %vm1958_vm7, %v943_v14  ;;  %vm1963_vm6 = vcmask 7168  }
 0x369   : > { %994 = vmatpush1.bf16.msra.mxu0 %v945_v32  ;;  %vm1964_vm4 = vmmov %vm1963_vm6 }
 0x36a   : > { %v926_v21 = vpop.permute.xlu1 %925  ;;  %v898_v9 = vpop.permute.xlu0 %897 }
 0x36b   : > { %v927_v42 = vsel %vm1959_vm1, %v924_v4, %v926_v21  ;;  %v931_v41 = vsel %vm1960_vm12, %v926_v21, %v924_v4  ;;  %vm1968_vm1 = vcmask 130048  }
 0x36c   : > { %v933_v8 = vsel %vm1937_vm3, %v927_v42, 0  ;;  %1176 = vmatprep.subr.msk.bf16.mxu0 %vm1961_vm9, %v931_v41  ;;  %vm1965_vm3 = vcmask 121856   ;;  %vm1969_vm12 = vmmov %vm1968_vm1 }
 0x36d   : > { %996 = vmatpush1.bf16.msra.mxu0 %v933_v8  ;;  %vm1966_vm7 = vmmov %vm1965_vm3 }
 0x36e   : > { %1177 = vmatprep.subr.msk.bf16.mxu0 %vm1962_vm5, %v868_v60  ;;  %v912_v54 = vpop.permute.xlu1 %911  ;;  %v886_v61 = vpop.permute.xlu0 %885  ;;  %vm1975_vm5 = vnez %v1926_v59 }
 0x36f   : > { %v913_v25 = vsel %vm1963_vm6, %v912_v54, %v910_v31  ;;  %v917_v34 = vsel %vm1964_vm4, %v910_v31, %v912_v54 }
 0x370   : > { %v919_v62 = vsel %vm1537_vm0, %v917_v34, 0  ;;  %vm1971_vm0 = vcmask 138240  }
 0x371   : > { %998 = vmatpush1.bf16.msra.mxu0 %v921_v46  ;;  %vm1972_vm9 = vmmov %vm1971_vm0 }
 0x372   : > { %v900_v35 = vpop.permute.xlu1 %899  ;;  %1178 = vmatprep.subr.msk.bf16.mxu0 %vm1533_vm14, %v913_v25  ;;  %v873_v39 = vpop.permute.xlu0 %872  ;;  %vm1970_vm14 = vnez %v1918_v27 }
 0x373   : > { %v901_v50 = vsel %vm1965_vm3, %v900_v35, %v898_v9  ;;  %v905_v36 = vsel %vm1966_vm7, %v898_v9, %v900_v35 }
 0x374   : > { %v907_v37 = vsel %vm1967_vm15, %v905_v36, 0 }
 0x375   : > { %1000 = vmatpush1.bf16.msra.mxu0 %v919_v62 }
 0x376   : > { %v888_v52 = vpop.permute.xlu1 %887  ;;  %1179 = vmatprep.subr.msk.bf16.mxu0 %vm1568_vm8, %v901_v50  ;;  %v960_v48 = vpop.permute.xlu0 %959  ;;  %vm1973_vm8 = vcmask 908288  }
 0x377   : > { %v889_v38 = vsel %vm1968_vm1, %v888_v52, %v886_v61  ;;  %v893_v15 = vsel %vm1969_vm12, %v886_v61, %v888_v52 }
 0x378   : > { %v895_v43 = vsel %vm1970_vm14, %v893_v15, 0 }
 0x379   : > { %1002 = vmatpush1.bf16.msra.mxu0 %v907_v37 }
 0x37a   : > { %v876_v16 = vpop.permute.xlu1 %875  ;;  %1180 = vmatprep.subr.msk.bf16.mxu0 %vm1586_vm11, %v889_v38  ;;  %vm1974_vm11 = vmmov %vm1973_vm8 }
 0x37b   : > { %v877_v44 = vsel %vm1971_vm0, %v876_v16, %v873_v39  ;;  %v881_v11 = vsel %vm1972_vm9, %v873_v39, %v876_v16 }
 0x37c   : > { %v883_v49 = vsel %vm1948_vm2, %v881_v11, 0 }
 0x37d   : > { %1004 = vmatpush1.bf16.msra.mxu0 %v895_v43 }
 0x37e   : > { %v962_v33 = vpop.permute.xlu1 %961  ;;  %1181 = vmatprep.subr.msk.bf16.mxu0 %vm1599_vm10, %v877_v44 }
 0x37f   : > { %v963_v40 = vsel %vm1973_vm8, %v960_v48, %v962_v33  ;;  %v967_v7 = vsel %vm1974_vm11, %v962_v33, %v960_v48 }
 0x380   : > { %v969_v27 = vsel %vm1975_vm5, %v963_v40, 0 }
 0x381   : > { %1006 = vmatpush1.bf16.msra.mxu0 %v883_v49 }
 0x382   : > { %1182 = vmatprep.subr.msk.bf16.mxu0 %vm1951_vm13, %v967_v7 }
 0x383   : > { %v973_v2 = vpop.permute.xlu0 %972 }
 0x385   : > { %1022 = vmatpush2.bf16.msra.mxu0 %v969_v27 }
 0x388   : > { %1024 = vmatmul.mubr.bf16.vlgmr.msra.gmra.mxu0 %v1243_v45 }
 0x38b   : > { %v977_v28 = vpop.permute.xlu1 %976 }
 0x448   : > { %v1025_v47 = vpop.f32.mrf.mxu0 }
 0x449   : > { %v1026_v29 = vadd.f32 %v1025_v47, %v973_v2 }
 0x44a   : > { %v1027_v51 = vpop.f32.mrf.mxu0 }
 0x44b   : > { %v1034_v58 = vadd.f32 %v1026_v29, %v681_v19  ;;  %v1028_v53 = vadd.f32 %v1027_v51, %v973_v2 }
 0x44c   : > { %v1029_v55 = vpop.f32.mrf.mxu0 }
 0x44d   : > { %v1038_v59 = vmax.f32 %v1034_v58, 0.0  ;;  %v1035_v56 = vadd.f32 %v1028_v53, %v682_v22  ;;  %v1030_v57 = vadd.f32 %v1029_v55, %v977_v28 }
 0x44e   : > { %v1031_v60 = vpop.f32.mrf.mxu0 }
 0x44f   : > { %1042 = vst [vmem:[%s258_s16] sm:$0xff] %v1038_v59  ;;  %v1039_v63 = vmax.f32 %v1035_v56, 0.0  ;;  %v1036_v0 = vadd.f32 %v1030_v57, %v683_v20  ;;  %v1032_v1 = vadd.f32 %v1031_v60, %v977_v28 }
 0x451   : > { %1043 = vst [vmem:[%s258_s16 + $0x8] sm:$0xff] %v1039_v63  ;;  %v1040_v3 = vmax.f32 %v1036_v0, 0.0  ;;  %v1037_v5 = vadd.f32 %v1032_v1, %v684_v24  ;;  %1052 = sbr.rel (!%p1340_p5) target bundleno = 1118 (0x45e), region = 82 }
 0x453   : > { %1044 = vst [vmem:[%s258_s16 + $0x10] sm:$0xff] %v1040_v3  ;;  %v1041_v19 = vmax.f32 %v1037_v5, 0.0 }
 0x455   : > { %1045 = vst [vmem:[%s258_s16 + $0x18] sm:$0xff] %v1041_v19 }
 0x456   : > { %v1068_v12 = vld [vmem:[%s258_s16] sm:$0xff] }
 0x457   : > { %1069 = vst [vmem:[%s1055_s23] sm:$0xff] %v1068_v12 }
 0x458   : > { %v1070_v22 = vld [vmem:[%s258_s16 + $0x8] sm:$0xff] }
 0x459   : > { %1071 = vst [vmem:[%s1055_s23 + $0x8] sm:$0xff] %v1070_v22 }
 0x45a   : > { %v1072_v4 = vld [vmem:[%s258_s16 + $0x10] sm:$0xff] }
 0x45b   : > { %1073 = vst [vmem:[%s1055_s23 + $0x20] sm:$0xff] %v1072_v4 }
 0x45c   : > { %v1074_v17 = vld [vmem:[%s258_s16 + $0x18] sm:$0xff] }
 0x45d   : > { %1075 = vst [vmem:[%s1055_s23 + $0x28] sm:$0xff] %v1074_v17 }
 0x45e PF: > { %p12_p10 = scmp.ge.s32.totalorder %s1327_s22, 4   ;;  %s1976_s18 = smov %s1262_s19 }
 0x45f   : > { %s1977_s19 = smov %s1338_s25  ;;  %s1978_s20 = smov %s1327_s22 }
 0x460   :  { %14 = sbr.rel (!%p12_p10) target bundleno = 2 (0x2), region = 136 }

</bundles_post_ra>
